<compile_context>
chip_gen: v5e
topology: v5e:2x2
jax: 0.10.0
libtpu: 0.0.40
codegen_flags: <defaults>
</compile_context>

<pallas_src>
import functools
import math

import jax
import jax.numpy as jnp
from jax import lax
from jax.experimental import pallas as pl
from jax.experimental.pallas import tpu as pltpu


_VMEM_LIMIT_BYTES = 48 * 1024 * 1024  # explicit scoped-VMEM limit (v5e default is 16 MiB)


def _layer_norm(y, g, b, eps):
    # One reduction pass: E[x] and E[x^2] together, var = E[x^2] - mu^2 (f32).
    mu = jnp.mean(y, axis=-1, keepdims=True)
    ms = jnp.mean(y * y, axis=-1, keepdims=True)
    var = ms - mu * mu
    return (y - mu) * lax.rsqrt(var + eps) * g + b


# -----------------------------------------------------------------------------
# Fused encoder-layer kernel
# -----------------------------------------------------------------------------

def _encoder_layer_kernel(x_ref, keep_ref,
                          wqkv_ref, bqkv_ref, wc_ref, bc_ref,
                          g1_ref, be1_ref,
                          w1_ref, b1_ref, w2_ref, b2_ref,
                          g2_ref, be2_ref,
                          o_ref, *, n_head, eps):
    x = x_ref[0]                              # [L, D] f32 activations
    L, D = x.shape
    dh = D // n_head
    mxu = wqkv_ref.dtype                      # bf16 (weights pre-cast HBM-side)

    # Additive key-padding bias, computed once for all heads: [1, 1, L].
    keep = keep_ref[...]                      # [1, 1, L] (1 = keep, 0 = mask)
    bias = jnp.where(keep == 0.0, jnp.float32(-1e9), jnp.float32(0.0))

    # Heads become the leading batch dim of every attention matmul.
    x_b = jnp.broadcast_to(x.astype(mxu), (n_head, L, D))          # [H, L, D]

    # --- head-batched QKV projection (bf16 MXU operands, f32 accumulation) ---
    # 1/sqrt(dh) is already folded into the Q columns of wqkv / bqkv.
    qkv = jnp.einsum("hld,hdf->hlf", x_b, wqkv_ref[...],
                     preferred_element_type=jnp.float32) + bqkv_ref[...]  # [H, L, 3dh]
    qh = qkv[..., 0 * dh:1 * dh].astype(mxu)
    kh = qkv[..., 1 * dh:2 * dh].astype(mxu)
    vh = qkv[..., 2 * dh:3 * dh].astype(mxu)

    # --- scaled dot-product attention, batched over heads --------------------
    s = jnp.einsum("hqd,hkd->hqk", qh, kh,
                   preferred_element_type=jnp.float32) + bias             # [H, L, L]
    s = s - jnp.max(s, axis=-1, keepdims=True)
    p = jnp.exp(s)
    p = p * pl.reciprocal(jnp.sum(p, axis=-1, keepdims=True), approx=True)
    ctx = jnp.einsum("hqk,hkd->hqd", p.astype(mxu), vh,
                     preferred_element_type=jnp.float32)                  # [H, L, dh]

    # --- output projection: per-head partial projections summed over heads ---
    # (== concat(heads) @ w_concat, without any lane re-packing / concatenate)
    attn = jnp.sum(
        jnp.einsum("hld,hdk->hlk", ctx.astype(mxu), wc_ref[...],
                   preferred_element_type=jnp.float32),
        axis=0) + bc_ref[...]                                             # [L, D]

    # residual + LayerNorm1 (dropout1 is identity in eval mode)
    y1 = _layer_norm(attn + x, g1_ref[...], be1_ref[...], eps)

    # --- position-wise FFN (w1 + ReLU + w2) + residual + LayerNorm2 ----------
    h1 = jnp.maximum(
        jnp.dot(y1.astype(mxu), w1_ref[...],
                preferred_element_type=jnp.float32) + b1_ref[...], 0.0)   # [L, F]
    f = jnp.dot(h1.astype(mxu), w2_ref[...],
                preferred_element_type=jnp.float32) + b2_ref[...]         # [L, D]
    y2 = _layer_norm(f + y1, g2_ref[...], be2_ref[...], eps)

    o_ref[0] = y2.astype(o_ref.dtype)


# -----------------------------------------------------------------------------
# Wrapper
# -----------------------------------------------------------------------------

def _prepare_weights(params, n_head, mxu_dtype):
    """One-time HBM-side weight prep: head-major layout, attention scale folded
    into Q, matmul weights pre-cast to bf16 (biases / LN params stay f32)."""
    D = params["w_concat"].shape[0]
    dh = D // n_head
    scale = 1.0 / math.sqrt(dh)

    def col_heads(w):      # [D, D] -> [H, D, dh]   (columns grouped per head)
        return jnp.transpose(w.reshape(D, n_head, dh), (1, 0, 2))

    def col_heads_b(b):    # [1, D] -> [H, 1, dh]
        return jnp.transpose(b.reshape(1, n_head, dh), (1, 0, 2))

    w_q, w_k, w_v = jnp.split(params["w_qkv"], 3, axis=-1)
    b_q, b_k, b_v = jnp.split(params["b_qkv"], 3, axis=-1)
    w_qkv_h = jnp.concatenate(
        [col_heads(w_q) * scale, col_heads(w_k), col_heads(w_v)], axis=-1)   # [H, D, 3dh]
    b_qkv_h = jnp.concatenate(
        [col_heads_b(b_q) * scale, col_heads_b(b_k), col_heads_b(b_v)], axis=-1)  # [H, 1, 3dh]
    w_concat_h = params["w_concat"].reshape(n_head, dh, D)                   # rows per head

    return (
        w_qkv_h.astype(mxu_dtype), b_qkv_h,
        w_concat_h.astype(mxu_dtype), params["b_concat"],
        params["ln1_g"], params["ln1_b"],
        params["ffn_w1"].astype(mxu_dtype), params["ffn_b1"],
        params["ffn_w2"].astype(mxu_dtype), params["ffn_b2"],
        params["ln2_g"], params["ln2_b"],
    )


def _build_call(B, L, D, weight_shapes, n_head, eps, weight_pipeline_mode):
    def resident(shape):
        # Full-array block + constant index map -> fetched once, VMEM-resident
        # across all grid steps.
        nd = len(shape)
        kwargs = {} if weight_pipeline_mode is None else {
            "pipeline_mode": weight_pipeline_mode}
        return pl.BlockSpec(shape, lambda b, _nd=nd: (0,) * _nd, **kwargs)

    grid_spec = pltpu.PrefetchScalarGridSpec(
        num_scalar_prefetch=0,
        grid=(B,),
        in_specs=[
            pl.BlockSpec((1, L, D), lambda b: (b, 0, 0)),    # activations
            pl.BlockSpec((1, 1, L), lambda b: (b, 0, 0)),    # key-keep vector
        ] + [resident(s) for s in weight_shapes],
        out_specs=pl.BlockSpec((1, L, D), lambda b: (b, 0, 0)),
    )
    kernel = functools.partial(_encoder_layer_kernel, n_head=n_head, eps=eps)
    return pl.pallas_call(
        kernel,
        out_shape=jax.ShapeDtypeStruct((B, L, D), jnp.float32),
        grid_spec=grid_spec,
        compiler_params=pltpu.CompilerParams(
            dimension_semantics=("parallel",),
            vmem_limit_bytes=_VMEM_LIMIT_BYTES),
    )


def encoder_layer(x, key_keep, params, n_head, eps=1e-5, mxu_dtype=jnp.bfloat16):
    """x: [B, L, D] f32; key_keep: [B, L] (1 = keep key, 0 = mask key) -> [B, L, D]."""
    B, L, D = x.shape
    assert D % n_head == 0
    # Lane/sublane-dense layout (perf): d_model multiple of 128, L multiple of 8.
    assert D % 128 == 0 and L % 8 == 0, "pad d_model / seq_len for lane density"

    weights = _prepare_weights(params, n_head, mxu_dtype)
    args = (x.astype(jnp.float32),
            key_keep.astype(jnp.float32).reshape(B, 1, L),
            *weights)
    shapes = [w.shape for w in weights]

    try:
        # Constant-index weights are never refetched, so the default double
        # buffering is pure VMEM waste (matters on v7x's 64 MiB): single-buffer.
        return _build_call(B, L, D, shapes, n_head, eps, pl.Buffered(1))(*args)
    except Exception:
        # Fallback for jax versions whose TPU lowering rejects single-buffering.
        return _build_call(B, L, D, shapes, n_head, eps, None)(*args)


# -----------------------------------------------------------------------------
# Pure-JAX f32 reference (for an in-script sanity check)
# -----------------------------------------------------------------------------

def encoder_layer_ref(x, key_keep, p, n_head, eps=1e-5):
    B, L, D = x.shape
    dh = D // n_head
    qkv = x @ p["w_qkv"] + p["b_qkv"]
    q, k, v = jnp.split(qkv, 3, axis=-1)

    def split(t):
        return t.reshape(B, L, n_head, dh).transpose(0, 2, 1, 3)

    qh, kh, vh = split(q), split(k), split(v)
    s = jnp.einsum("bhqd,bhkd->bhqk", qh, kh) / math.sqrt(dh)
    mask = key_keep[:, None, None, :]            # [B, 1, 1, L], like a src pad mask
    s = jnp.where(mask == 0, -1e9, s)
    attn = jnp.einsum("bhqk,bhkd->bhqd", jax.nn.softmax(s, axis=-1), vh)
    attn = attn.transpose(0, 2, 1, 3).reshape(B, L, D)
    attn = attn @ p["w_concat"] + p["b_concat"]

    def ln(y, g, b):
        mu = y.mean(-1, keepdims=True)
        var = ((y - mu) ** 2).mean(-1, keepdims=True)
        return (y - mu) / jnp.sqrt(var + eps) * g + b

    y1 = ln(attn + x, p["ln1_g"], p["ln1_b"])
    h = jnp.maximum(y1 @ p["ffn_w1"] + p["ffn_b1"], 0.0)
    f = h @ p["ffn_w2"] + p["ffn_b2"]
    return ln(f + y1, p["ln2_g"], p["ln2_b"])


# -----------------------------------------------------------------------------
# Deterministic parameter init
# -----------------------------------------------------------------------------

def init_encoder_layer(key, d_model, ffn_hidden):
    ks = jax.random.split(key, 8)

    def w(k, din, dout, scale=0.02):
        return scale * jax.random.normal(k, (din, dout), jnp.float32)

    return dict(
        w_qkv=w(ks[0], d_model, 3 * d_model),
        b_qkv=0.01 * jax.random.normal(ks[1], (1, 3 * d_model), jnp.float32),
        w_concat=w(ks[2], d_model, d_model),
        b_concat=0.01 * jax.random.normal(ks[3], (1, d_model), jnp.float32),
        ln1_g=jnp.ones((1, d_model), jnp.float32),
        ln1_b=jnp.zeros((1, d_model), jnp.float32),
        ffn_w1=w(ks[4], d_model, ffn_hidden),
        ffn_b1=0.01 * jax.random.normal(ks[5], (1, ffn_hidden), jnp.float32),
        ffn_w2=w(ks[6], ffn_hidden, d_model),
        ffn_b2=0.01 * jax.random.normal(ks[7], (1, d_model), jnp.float32),
        ln2_g=jnp.ones((1, d_model), jnp.float32),
        ln2_b=jnp.zeros((1, d_model), jnp.float32),
    )


# -----------------------------------------------------------------------------
# Main
# -----------------------------------------------------------------------------

if __name__ == "__main__":
    d_model = 128        # multiple of 128 -> lane-dense stores / full MXU tiles
    ffn_hidden = 256
    n_head = 4
    B, L = 2, 8

    key = jax.random.PRNGKey(0)
    k_params, k_x = jax.random.split(key)

    params = init_encoder_layer(k_params, d_model, ffn_hidden)
    x = jax.random.normal(k_x, (B, L, d_model), jnp.float32)

    # Key-padding mask as a per-key keep vector [B, L] (1 = keep, 0 = mask);
    # equivalent to the usual broadcast [B, 1, L, L] source mask, but L x
    # cheaper to DMA. Batch 0 keeps all keys, batch 1 masks the last two.
    key_keep = jnp.array([[1.0] * L,
                          [1.0] * (L - 2) + [0.0] * 2], jnp.float32)

    out = encoder_layer(x, key_keep, params, n_head)
    out = jax.block_until_ready(out)

    ref = encoder_layer_ref(x, key_keep, params, n_head)
    assert out.shape == (B, L, d_model)
    assert bool(jnp.all(jnp.isfinite(out)))
    max_err = float(jnp.max(jnp.abs(out - ref)))
    # bf16 MXU operands + approx softmax reciprocal vs. the pure-f32 reference.
    assert max_err < 5e-2, f"max abs err vs f32 reference: {max_err}"
    print("KERNEL_OK")
</pallas_src>

<mosaic_0001>
module attributes {stable_mosaic.version = 11 : i64} {
  func.func @_encoder_layer_kernel(%arg0: i32, %arg1: memref<1x8x128xf32, #tpu.memory_space<vmem>>, %arg2: memref<1x1x8xf32, #tpu.memory_space<vmem>>, %arg3: memref<4x128x96xbf16, #tpu.memory_space<vmem>>, %arg4: memref<4x1x96xf32, #tpu.memory_space<vmem>>, %arg5: memref<4x32x128xbf16, #tpu.memory_space<vmem>>, %arg6: memref<1x128xf32, #tpu.memory_space<vmem>>, %arg7: memref<1x128xf32, #tpu.memory_space<vmem>>, %arg8: memref<1x128xf32, #tpu.memory_space<vmem>>, %arg9: memref<128x256xbf16, #tpu.memory_space<vmem>>, %arg10: memref<1x256xf32, #tpu.memory_space<vmem>>, %arg11: memref<256x128xbf16, #tpu.memory_space<vmem>>, %arg12: memref<1x128xf32, #tpu.memory_space<vmem>>, %arg13: memref<1x128xf32, #tpu.memory_space<vmem>>, %arg14: memref<1x128xf32, #tpu.memory_space<vmem>>, %arg15: memref<1x8x128xf32, #tpu.memory_space<vmem>>) attributes {dimension_semantics = [#tpu.dimension_semantics<parallel>], iteration_bounds = array<i64: 2>, scalar_prefetch = 0 : i64, scratch_operands = 0 : i64, tpu.core_type = #tpu.core_type<tc>, window_params = [{transform_indices = @transform_0, window_bounds = array<i64: 1, 8, 128>}, {transform_indices = @transform_1, window_bounds = array<i64: 1, 1, 8>}, {pipeline_mode = #tpu.pipeline_mode<synchronous>, transform_indices = @transform_2, window_bounds = array<i64: 4, 128, 96>}, {pipeline_mode = #tpu.pipeline_mode<synchronous>, transform_indices = @transform_3, window_bounds = array<i64: 4, 1, 96>}, {pipeline_mode = #tpu.pipeline_mode<synchronous>, transform_indices = @transform_4, window_bounds = array<i64: 4, 32, 128>}, {pipeline_mode = #tpu.pipeline_mode<synchronous>, transform_indices = @transform_5, window_bounds = array<i64: 1, 128>}, {pipeline_mode = #tpu.pipeline_mode<synchronous>, transform_indices = @transform_6, window_bounds = array<i64: 1, 128>}, {pipeline_mode = #tpu.pipeline_mode<synchronous>, transform_indices = @transform_7, window_bounds = array<i64: 1, 128>}, {pipeline_mode = #tpu.pipeline_mode<synchronous>, transform_indices = @transform_8, window_bounds = array<i64: 128, 256>}, {pipeline_mode = #tpu.pipeline_mode<synchronous>, transform_indices = @transform_9, window_bounds = array<i64: 1, 256>}, {pipeline_mode = #tpu.pipeline_mode<synchronous>, transform_indices = @transform_10, window_bounds = array<i64: 256, 128>}, {pipeline_mode = #tpu.pipeline_mode<synchronous>, transform_indices = @transform_11, window_bounds = array<i64: 1, 128>}, {pipeline_mode = #tpu.pipeline_mode<synchronous>, transform_indices = @transform_12, window_bounds = array<i64: 1, 128>}, {pipeline_mode = #tpu.pipeline_mode<synchronous>, transform_indices = @transform_13, window_bounds = array<i64: 1, 128>}, {transform_indices = @transform_14, window_bounds = array<i64: 1, 8, 128>}]} {
    %c0 = arith.constant 0 : index
    %c0_0 = arith.constant 0 : index
    %c0_1 = arith.constant 0 : index
    %0 = vector.load %arg1[%c0, %c0_0, %c0_1] : memref<1x8x128xf32, #tpu.memory_space<vmem>>, vector<1x8x128xf32>
    %1 = vector.shape_cast %0 : vector<1x8x128xf32> to vector<8x128xf32>
    %c0_2 = arith.constant 0 : index
    %c0_3 = arith.constant 0 : index
    %c0_4 = arith.constant 0 : index
    %2 = vector.load %arg2[%c0_2, %c0_3, %c0_4] : memref<1x1x8xf32, #tpu.memory_space<vmem>>, vector<1x1x8xf32>
    %cst = arith.constant 0.000000e+00 : f32
    %3 = vector.broadcast %cst : f32 to vector<1x1x8xf32>
    %4 = arith.cmpf oeq, %2, %3 : vector<1x1x8xf32>
    %cst_5 = arith.constant -1.000000e+09 : f32
    %cst_6 = arith.constant 0.000000e+00 : f32
    %5 = vector.broadcast %cst_5 : f32 to vector<1x1x8xf32>
    %6 = vector.broadcast %cst_6 : f32 to vector<1x1x8xf32>
    %7 = arith.select %4, %5, %6 : vector<1x1x8xi1>, vector<1x1x8xf32>
    %8 = arith.truncf %1 : vector<8x128xf32> to vector<8x128xbf16>
    %9 = vector.shape_cast %8 : vector<8x128xbf16> to vector<1x8x128xbf16>
    %10 = vector.broadcast %9 : vector<1x8x128xbf16> to vector<4x8x128xbf16>
    %c0_7 = arith.constant 0 : index
    %c0_8 = arith.constant 0 : index
    %c0_9 = arith.constant 0 : index
    %11 = vector.load %arg3[%c0_7, %c0_8, %c0_9] : memref<4x128x96xbf16, #tpu.memory_space<vmem>>, vector<4x128x96xbf16>
    "tpu.trace_start"() <{level = 10 : i32, message = "hld,hdf->hlf"}> : () -> ()
    %cst_10 = arith.constant dense<0.000000e+00> : vector<4x8x96xf32>
    %12 = tpu.matmul %10, %11, %cst_10 {dimension_numbers = #tpu.dot_dimension_numbers<[2], [1], [1], [2], [0, 0, 0, 1, 1, 2], [0], [0]>} : vector<4x8x128xbf16>, vector<4x128x96xbf16>, vector<4x8x96xf32> -> vector<4x8x96xf32>
    "tpu.trace_stop"() : () -> ()
    %c0_11 = arith.constant 0 : index
    %c0_12 = arith.constant 0 : index
    %c0_13 = arith.constant 0 : index
    %13 = vector.load %arg4[%c0_11, %c0_12, %c0_13] : memref<4x1x96xf32, #tpu.memory_space<vmem>>, vector<4x1x96xf32>
    %14 = vector.broadcast %13 : vector<4x1x96xf32> to vector<4x8x96xf32>
    %15 = arith.addf %12, %14 : vector<4x8x96xf32>
    %16 = vector.extract_strided_slice %15 {offsets = [0, 0, 0], sizes = [4, 8, 32], strides = [1, 1, 1]} : vector<4x8x96xf32> to vector<4x8x32xf32>
    %17 = arith.truncf %16 : vector<4x8x32xf32> to vector<4x8x32xbf16>
    %18 = vector.extract_strided_slice %15 {offsets = [0, 0, 32], sizes = [4, 8, 32], strides = [1, 1, 1]} : vector<4x8x96xf32> to vector<4x8x32xf32>
    %19 = arith.truncf %18 : vector<4x8x32xf32> to vector<4x8x32xbf16>
    %20 = vector.extract_strided_slice %15 {offsets = [0, 0, 64], sizes = [4, 8, 32], strides = [1, 1, 1]} : vector<4x8x96xf32> to vector<4x8x32xf32>
    %21 = arith.truncf %20 : vector<4x8x32xf32> to vector<4x8x32xbf16>
    "tpu.trace_start"() <{level = 10 : i32, message = "hqd,hkd->hqk"}> : () -> ()
    %cst_14 = arith.constant dense<0.000000e+00> : vector<4x8x8xf32>
    %22 = tpu.matmul %17, %19, %cst_14 {dimension_numbers = #tpu.dot_dimension_numbers<[2], [2], [1], [1], [0, 0, 0, 1, 1, 1], [0], [0]>} : vector<4x8x32xbf16>, vector<4x8x32xbf16>, vector<4x8x8xf32> -> vector<4x8x8xf32>
    "tpu.trace_stop"() : () -> ()
    %23 = vector.broadcast %7 : vector<1x1x8xf32> to vector<4x8x8xf32>
    %24 = arith.addf %22, %23 : vector<4x8x8xf32>
    %cst_15 = arith.constant dense<0xFF800000> : vector<4x8xf32>
    %25 = vector.multi_reduction <maximumf>, %24, %cst_15 [2] : vector<4x8x8xf32> to vector<4x8xf32>
    %26 = vector.shape_cast %25 : vector<4x8xf32> to vector<4x8x1xf32>
    %27 = vector.broadcast %26 : vector<4x8x1xf32> to vector<4x8x8xf32>
    %28 = arith.subf %24, %27 : vector<4x8x8xf32>
    %29 = math.exp %28 : vector<4x8x8xf32>
    %cst_16 = arith.constant dense<0.000000e+00> : vector<4x8xf32>
    %30 = vector.multi_reduction <add>, %29, %cst_16 [2] : vector<4x8x8xf32> to vector<4x8xf32>
    %31 = vector.shape_cast %30 : vector<4x8xf32> to vector<4x8x1xf32>
    %32 = tpu.reciprocal %31 {approx = true} : vector<4x8x1xf32> -> vector<4x8x1xf32>
    %33 = vector.broadcast %32 : vector<4x8x1xf32> to vector<4x8x8xf32>
    %34 = arith.mulf %29, %33 : vector<4x8x8xf32>
    %35 = arith.truncf %34 : vector<4x8x8xf32> to vector<4x8x8xbf16>
    "tpu.trace_start"() <{level = 10 : i32, message = "hqk,hkd->hqd"}> : () -> ()
    %cst_17 = arith.constant dense<0.000000e+00> : vector<4x8x32xf32>
    %36 = tpu.matmul %35, %21, %cst_17 {dimension_numbers = #tpu.dot_dimension_numbers<[2], [1], [1], [2], [0, 0, 0, 1, 1, 2], [0], [0]>} : vector<4x8x8xbf16>, vector<4x8x32xbf16>, vector<4x8x32xf32> -> vector<4x8x32xf32>
    "tpu.trace_stop"() : () -> ()
    %37 = arith.truncf %36 : vector<4x8x32xf32> to vector<4x8x32xbf16>
    %c0_18 = arith.constant 0 : index
    %c0_19 = arith.constant 0 : index
    %c0_20 = arith.constant 0 : index
    %38 = vector.load %arg5[%c0_18, %c0_19, %c0_20] : memref<4x32x128xbf16, #tpu.memory_space<vmem>>, vector<4x32x128xbf16>
    "tpu.trace_start"() <{level = 10 : i32, message = "hld,hdk->hlk"}> : () -> ()
    %cst_21 = arith.constant dense<0.000000e+00> : vector<4x8x128xf32>
    %39 = tpu.matmul %37, %38, %cst_21 {dimension_numbers = #tpu.dot_dimension_numbers<[2], [1], [1], [2], [0, 0, 0, 1, 1, 2], [0], [0]>} : vector<4x8x32xbf16>, vector<4x32x128xbf16>, vector<4x8x128xf32> -> vector<4x8x128xf32>
    "tpu.trace_stop"() : () -> ()
    %cst_22 = arith.constant dense<0.000000e+00> : vector<8x128xf32>
    %40 = vector.multi_reduction <add>, %39, %cst_22 [0] : vector<4x8x128xf32> to vector<8x128xf32>
    %c0_23 = arith.constant 0 : index
    %c0_24 = arith.constant 0 : index
    %41 = vector.load %arg6[%c0_23, %c0_24] : memref<1x128xf32, #tpu.memory_space<vmem>>, vector<1x128xf32>
    %42 = vector.broadcast %41 : vector<1x128xf32> to vector<8x128xf32>
    %43 = arith.addf %40, %42 : vector<8x128xf32>
    %44 = arith.addf %43, %1 : vector<8x128xf32>
    %c0_25 = arith.constant 0 : index
    %c0_26 = arith.constant 0 : index
    %45 = vector.load %arg7[%c0_25, %c0_26] : memref<1x128xf32, #tpu.memory_space<vmem>>, vector<1x128xf32>
    %c0_27 = arith.constant 0 : index
    %c0_28 = arith.constant 0 : index
    %46 = vector.load %arg8[%c0_27, %c0_28] : memref<1x128xf32, #tpu.memory_space<vmem>>, vector<1x128xf32>
    %cst_29 = arith.constant dense<0.000000e+00> : vector<8xf32>
    %47 = vector.multi_reduction <add>, %44, %cst_29 [1] : vector<8x128xf32> to vector<8xf32>
    %48 = vector.shape_cast %47 : vector<8xf32> to vector<8x1xf32>
    %cst_30 = arith.constant 1.280000e+02 : f32
    %49 = vector.broadcast %cst_30 : f32 to vector<8x1xf32>
    %50 = arith.divf %48, %49 : vector<8x1xf32>
    %51 = arith.mulf %44, %44 : vector<8x128xf32>
    %cst_31 = arith.constant dense<0.000000e+00> : vector<8xf32>
    %52 = vector.multi_reduction <add>, %51, %cst_31 [1] : vector<8x128xf32> to vector<8xf32>
    %53 = vector.shape_cast %52 : vector<8xf32> to vector<8x1xf32>
    %cst_32 = arith.constant 1.280000e+02 : f32
    %54 = vector.broadcast %cst_32 : f32 to vector<8x1xf32>
    %55 = arith.divf %53, %54 : vector<8x1xf32>
    %56 = arith.mulf %50, %50 : vector<8x1xf32>
    %57 = arith.subf %55, %56 : vector<8x1xf32>
    %58 = vector.broadcast %50 : vector<8x1xf32> to vector<8x128xf32>
    %59 = arith.subf %44, %58 : vector<8x128xf32>
    %cst_33 = arith.constant 9.99999974E-6 : f32
    %60 = vector.broadcast %cst_33 : f32 to vector<8x1xf32>
    %61 = arith.addf %57, %60 : vector<8x1xf32>
    %62 = math.rsqrt %61 : vector<8x1xf32>
    %63 = vector.broadcast %62 : vector<8x1xf32> to vector<8x128xf32>
    %64 = arith.mulf %59, %63 : vector<8x128xf32>
    %65 = vector.broadcast %45 : vector<1x128xf32> to vector<8x128xf32>
    %66 = arith.mulf %64, %65 : vector<8x128xf32>
    %67 = vector.broadcast %46 : vector<1x128xf32> to vector<8x128xf32>
    %68 = arith.addf %66, %67 : vector<8x128xf32>
    %69 = arith.truncf %68 : vector<8x128xf32> to vector<8x128xbf16>
    %c0_34 = arith.constant 0 : index
    %c0_35 = arith.constant 0 : index
    %70 = vector.load %arg9[%c0_34, %c0_35] : memref<128x256xbf16, #tpu.memory_space<vmem>>, vector<128x256xbf16>
    %cst_36 = arith.constant dense<0.000000e+00> : vector<8x256xf32>
    %71 = tpu.matmul %69, %70, %cst_36 {dimension_numbers = #tpu.dot_dimension_numbers<[1], [0], [0], [1], [0, 0, 1, 1], [], []>} : vector<8x128xbf16>, vector<128x256xbf16>, vector<8x256xf32> -> vector<8x256xf32>
    %c0_37 = arith.constant 0 : index
    %c0_38 = arith.constant 0 : index
    %72 = vector.load %arg10[%c0_37, %c0_38] : memref<1x256xf32, #tpu.memory_space<vmem>>, vector<1x256xf32>
    %73 = vector.broadcast %72 : vector<1x256xf32> to vector<8x256xf32>
    %74 = arith.addf %71, %73 : vector<8x256xf32>
    %cst_39 = arith.constant 0.000000e+00 : f32
    %75 = vector.broadcast %cst_39 : f32 to vector<8x256xf32>
    %76 = arith.maximumf %74, %75 : vector<8x256xf32>
    %77 = arith.truncf %76 : vector<8x256xf32> to vector<8x256xbf16>
    %c0_40 = arith.constant 0 : index
    %c0_41 = arith.constant 0 : index
    %78 = vector.load %arg11[%c0_40, %c0_41] : memref<256x128xbf16, #tpu.memory_space<vmem>>, vector<256x128xbf16>
    %cst_42 = arith.constant dense<0.000000e+00> : vector<8x128xf32>
    %79 = tpu.matmul %77, %78, %cst_42 {dimension_numbers = #tpu.dot_dimension_numbers<[1], [0], [0], [1], [0, 0, 1, 1], [], []>} : vector<8x256xbf16>, vector<256x128xbf16>, vector<8x128xf32> -> vector<8x128xf32>
    %c0_43 = arith.constant 0 : index
    %c0_44 = arith.constant 0 : index
    %80 = vector.load %arg12[%c0_43, %c0_44] : memref<1x128xf32, #tpu.memory_space<vmem>>, vector<1x128xf32>
    %81 = vector.broadcast %80 : vector<1x128xf32> to vector<8x128xf32>
    %82 = arith.addf %79, %81 : vector<8x128xf32>
    %83 = arith.addf %82, %68 : vector<8x128xf32>
    %c0_45 = arith.constant 0 : index
    %c0_46 = arith.constant 0 : index
    %84 = vector.load %arg13[%c0_45, %c0_46] : memref<1x128xf32, #tpu.memory_space<vmem>>, vector<1x128xf32>
    %c0_47 = arith.constant 0 : index
    %c0_48 = arith.constant 0 : index
    %85 = vector.load %arg14[%c0_47, %c0_48] : memref<1x128xf32, #tpu.memory_space<vmem>>, vector<1x128xf32>
    %cst_49 = arith.constant dense<0.000000e+00> : vector<8xf32>
    %86 = vector.multi_reduction <add>, %83, %cst_49 [1] : vector<8x128xf32> to vector<8xf32>
    %87 = vector.shape_cast %86 : vector<8xf32> to vector<8x1xf32>
    %cst_50 = arith.constant 1.280000e+02 : f32
    %88 = vector.broadcast %cst_50 : f32 to vector<8x1xf32>
    %89 = arith.divf %87, %88 : vector<8x1xf32>
    %90 = arith.mulf %83, %83 : vector<8x128xf32>
    %cst_51 = arith.constant dense<0.000000e+00> : vector<8xf32>
    %91 = vector.multi_reduction <add>, %90, %cst_51 [1] : vector<8x128xf32> to vector<8xf32>
    %92 = vector.shape_cast %91 : vector<8xf32> to vector<8x1xf32>
    %cst_52 = arith.constant 1.280000e+02 : f32
    %93 = vector.broadcast %cst_52 : f32 to vector<8x1xf32>
    %94 = arith.divf %92, %93 : vector<8x1xf32>
    %95 = arith.mulf %89, %89 : vector<8x1xf32>
    %96 = arith.subf %94, %95 : vector<8x1xf32>
    %97 = vector.broadcast %89 : vector<8x1xf32> to vector<8x128xf32>
    %98 = arith.subf %83, %97 : vector<8x128xf32>
    %cst_53 = arith.constant 9.99999974E-6 : f32
    %99 = vector.broadcast %cst_53 : f32 to vector<8x1xf32>
    %100 = arith.addf %96, %99 : vector<8x1xf32>
    %101 = math.rsqrt %100 : vector<8x1xf32>
    %102 = vector.broadcast %101 : vector<8x1xf32> to vector<8x128xf32>
    %103 = arith.mulf %98, %102 : vector<8x128xf32>
    %104 = vector.broadcast %84 : vector<1x128xf32> to vector<8x128xf32>
    %105 = arith.mulf %103, %104 : vector<8x128xf32>
    %106 = vector.broadcast %85 : vector<1x128xf32> to vector<8x128xf32>
    %107 = arith.addf %105, %106 : vector<8x128xf32>
    %c0_54 = arith.constant 0 : index
    %c0_55 = arith.constant 0 : index
    %c0_56 = arith.constant 0 : index
    %108 = vector.load %arg15[%c0_54, %c0_55, %c0_56] : memref<1x8x128xf32, #tpu.memory_space<vmem>>, vector<1x8x128xf32>
    %109 = vector.shape_cast %108 : vector<1x8x128xf32> to vector<8x128xf32>
    %110 = vector.shape_cast %107 : vector<8x128xf32> to vector<1x8x128xf32>
    tpu.vector_store %arg15[%c0_54, %c0_55, %c0_56], %110 {strides = array<i32>} : memref<1x8x128xf32, #tpu.memory_space<vmem>>, vector<1x8x128xf32>,
    return
  }
  func.func @transform_0(%arg0: i32) -> (i32, i32, i32) {
    %c0_i32 = arith.constant 0 : i32
    %c0_i32_0 = arith.constant 0 : i32
    %c0_i32_1 = arith.constant 0 : i32
    return %arg0, %c0_i32, %c0_i32_0 : i32, i32, i32
  }
  func.func @transform_1(%arg0: i32) -> (i32, i32, i32) {
    %c0_i32 = arith.constant 0 : i32
    %c0_i32_0 = arith.constant 0 : i32
    %c0_i32_1 = arith.constant 0 : i32
    return %arg0, %c0_i32, %c0_i32_0 : i32, i32, i32
  }
  func.func @transform_2(%arg0: i32) -> (i32, i32, i32) {
    %c0_i32 = arith.constant 0 : i32
    %c0_i32_0 = arith.constant 0 : i32
    %c0_i32_1 = arith.constant 0 : i32
    %c0_i32_2 = arith.constant 0 : i32
    return %c0_i32, %c0_i32_0, %c0_i32_1 : i32, i32, i32
  }
  func.func @transform_3(%arg0: i32) -> (i32, i32, i32) {
    %c0_i32 = arith.constant 0 : i32
    %c0_i32_0 = arith.constant 0 : i32
    %c0_i32_1 = arith.constant 0 : i32
    %c0_i32_2 = arith.constant 0 : i32
    return %c0_i32, %c0_i32_0, %c0_i32_1 : i32, i32, i32
  }
  func.func @transform_4(%arg0: i32) -> (i32, i32, i32) {
    %c0_i32 = arith.constant 0 : i32
    %c0_i32_0 = arith.constant 0 : i32
    %c0_i32_1 = arith.constant 0 : i32
    %c0_i32_2 = arith.constant 0 : i32
    return %c0_i32, %c0_i32_0, %c0_i32_1 : i32, i32, i32
  }
  func.func @transform_5(%arg0: i32) -> (i32, i32) {
    %c0_i32 = arith.constant 0 : i32
    %c0_i32_0 = arith.constant 0 : i32
    %c0_i32_1 = arith.constant 0 : i32
    return %c0_i32, %c0_i32_0 : i32, i32
  }
  func.func @transform_6(%arg0: i32) -> (i32, i32) {
    %c0_i32 = arith.constant 0 : i32
    %c0_i32_0 = arith.constant 0 : i32
    %c0_i32_1 = arith.constant 0 : i32
    return %c0_i32, %c0_i32_0 : i32, i32
  }
  func.func @transform_7(%arg0: i32) -> (i32, i32) {
    %c0_i32 = arith.constant 0 : i32
    %c0_i32_0 = arith.constant 0 : i32
    %c0_i32_1 = arith.constant 0 : i32
    return %c0_i32, %c0_i32_0 : i32, i32
  }
  func.func @transform_8(%arg0: i32) -> (i32, i32) {
    %c0_i32 = arith.constant 0 : i32
    %c0_i32_0 = arith.constant 0 : i32
    %c0_i32_1 = arith.constant 0 : i32
    return %c0_i32, %c0_i32_0 : i32, i32
  }
  func.func @transform_9(%arg0: i32) -> (i32, i32) {
    %c0_i32 = arith.constant 0 : i32
    %c0_i32_0 = arith.constant 0 : i32
    %c0_i32_1 = arith.constant 0 : i32
    return %c0_i32, %c0_i32_0 : i32, i32
  }
  func.func @transform_10(%arg0: i32) -> (i32, i32) {
    %c0_i32 = arith.constant 0 : i32
    %c0_i32_0 = arith.constant 0 : i32
    %c0_i32_1 = arith.constant 0 : i32
    return %c0_i32, %c0_i32_0 : i32, i32
  }
  func.func @transform_11(%arg0: i32) -> (i32, i32) {
    %c0_i32 = arith.constant 0 : i32
    %c0_i32_0 = arith.constant 0 : i32
    %c0_i32_1 = arith.constant 0 : i32
    return %c0_i32, %c0_i32_0 : i32, i32
  }
  func.func @transform_12(%arg0: i32) -> (i32, i32) {
    %c0_i32 = arith.constant 0 : i32
    %c0_i32_0 = arith.constant 0 : i32
    %c0_i32_1 = arith.constant 0 : i32
    return %c0_i32, %c0_i32_0 : i32, i32
  }
  func.func @transform_13(%arg0: i32) -> (i32, i32) {
    %c0_i32 = arith.constant 0 : i32
    %c0_i32_0 = arith.constant 0 : i32
    %c0_i32_1 = arith.constant 0 : i32
    return %c0_i32, %c0_i32_0 : i32, i32
  }
  func.func @transform_14(%arg0: i32) -> (i32, i32, i32) {
    %c0_i32 = arith.constant 0 : i32
    %c0_i32_0 = arith.constant 0 : i32
    %c0_i32_1 = arith.constant 0 : i32
    return %arg0, %c0_i32, %c0_i32_0 : i32, i32, i32
  }
}

module attributes {stable_mosaic.version = 11 : i64} {
  func.func @_encoder_layer_kernel(%arg0: i32, %arg1: memref<1x8x128xf32, #tpu.memory_space<vmem>>, %arg2: memref<1x1x8xf32, #tpu.memory_space<vmem>>, %arg3: memref<4x128x96xbf16, #tpu.memory_space<vmem>>, %arg4: memref<4x1x96xf32, #tpu.memory_space<vmem>>, %arg5: memref<4x32x128xbf16, #tpu.memory_space<vmem>>, %arg6: memref<1x128xf32, #tpu.memory_space<vmem>>, %arg7: memref<1x128xf32, #tpu.memory_space<vmem>>, %arg8: memref<1x128xf32, #tpu.memory_space<vmem>>, %arg9: memref<128x256xbf16, #tpu.memory_space<vmem>>, %arg10: memref<1x256xf32, #tpu.memory_space<vmem>>, %arg11: memref<256x128xbf16, #tpu.memory_space<vmem>>, %arg12: memref<1x128xf32, #tpu.memory_space<vmem>>, %arg13: memref<1x128xf32, #tpu.memory_space<vmem>>, %arg14: memref<1x128xf32, #tpu.memory_space<vmem>>, %arg15: memref<1x8x128xf32, #tpu.memory_space<vmem>>) attributes {dimension_semantics = [#tpu.dimension_semantics<parallel>], iteration_bounds = array<i64: 2>, scalar_prefetch = 0 : i64, scratch_operands = 0 : i64, tpu.core_type = #tpu.core_type<tc>, window_params = [{transform_indices = @transform_0, window_bounds = array<i64: 1, 8, 128>}, {transform_indices = @transform_1, window_bounds = array<i64: 1, 1, 8>}, {pipeline_mode = #tpu.pipeline_mode<synchronous>, transform_indices = @transform_2, window_bounds = array<i64: 4, 128, 96>}, {pipeline_mode = #tpu.pipeline_mode<synchronous>, transform_indices = @transform_3, window_bounds = array<i64: 4, 1, 96>}, {pipeline_mode = #tpu.pipeline_mode<synchronous>, transform_indices = @transform_4, window_bounds = array<i64: 4, 32, 128>}, {pipeline_mode = #tpu.pipeline_mode<synchronous>, transform_indices = @transform_5, window_bounds = array<i64: 1, 128>}, {pipeline_mode = #tpu.pipeline_mode<synchronous>, transform_indices = @transform_6, window_bounds = array<i64: 1, 128>}, {pipeline_mode = #tpu.pipeline_mode<synchronous>, transform_indices = @transform_7, window_bounds = array<i64: 1, 128>}, {pipeline_mode = #tpu.pipeline_mode<synchronous>, transform_indices = @transform_8, window_bounds = array<i64: 128, 256>}, {pipeline_mode = #tpu.pipeline_mode<synchronous>, transform_indices = @transform_9, window_bounds = array<i64: 1, 256>}, {pipeline_mode = #tpu.pipeline_mode<synchronous>, transform_indices = @transform_10, window_bounds = array<i64: 256, 128>}, {pipeline_mode = #tpu.pipeline_mode<synchronous>, transform_indices = @transform_11, window_bounds = array<i64: 1, 128>}, {pipeline_mode = #tpu.pipeline_mode<synchronous>, transform_indices = @transform_12, window_bounds = array<i64: 1, 128>}, {pipeline_mode = #tpu.pipeline_mode<synchronous>, transform_indices = @transform_13, window_bounds = array<i64: 1, 128>}, {transform_indices = @transform_14, window_bounds = array<i64: 1, 8, 128>}]} {
    %c0 = arith.constant 0 : index
    %c0_0 = arith.constant 0 : index
    %c0_1 = arith.constant 0 : index
    %0 = vector.load %arg1[%c0, %c0_0, %c0_1] : memref<1x8x128xf32, #tpu.memory_space<vmem>>, vector<1x8x128xf32>
    %1 = vector.shape_cast %0 : vector<1x8x128xf32> to vector<8x128xf32>
    %c0_2 = arith.constant 0 : index
    %c0_3 = arith.constant 0 : index
    %c0_4 = arith.constant 0 : index
    %2 = vector.load %arg2[%c0_2, %c0_3, %c0_4] : memref<1x1x8xf32, #tpu.memory_space<vmem>>, vector<1x1x8xf32>
    %cst = arith.constant 0.000000e+00 : f32
    %3 = vector.broadcast %cst : f32 to vector<1x1x8xf32>
    %4 = arith.cmpf oeq, %2, %3 : vector<1x1x8xf32>
    %cst_5 = arith.constant -1.000000e+09 : f32
    %cst_6 = arith.constant 0.000000e+00 : f32
    %5 = vector.broadcast %cst_5 : f32 to vector<1x1x8xf32>
    %6 = vector.broadcast %cst_6 : f32 to vector<1x1x8xf32>
    %7 = arith.select %4, %5, %6 : vector<1x1x8xi1>, vector<1x1x8xf32>
    %8 = arith.truncf %1 : vector<8x128xf32> to vector<8x128xbf16>
    %9 = vector.shape_cast %8 : vector<8x128xbf16> to vector<1x8x128xbf16>
    %10 = vector.broadcast %9 : vector<1x8x128xbf16> to vector<4x8x128xbf16>
    %c0_7 = arith.constant 0 : index
    %c0_8 = arith.constant 0 : index
    %c0_9 = arith.constant 0 : index
    %11 = vector.load %arg3[%c0_7, %c0_8, %c0_9] : memref<4x128x96xbf16, #tpu.memory_space<vmem>>, vector<4x128x96xbf16>
    "tpu.trace_start"() <{level = 10 : i32, message = "hld,hdf->hlf"}> : () -> ()
    %cst_10 = arith.constant dense<0.000000e+00> : vector<4x8x96xf32>
    %12 = tpu.matmul %10, %11, %cst_10 {dimension_numbers = #tpu.dot_dimension_numbers<[2], [1], [1], [2], [0, 0, 0, 1, 1, 2], [0], [0]>} : vector<4x8x128xbf16>, vector<4x128x96xbf16>, vector<4x8x96xf32> -> vector<4x8x96xf32>
    "tpu.trace_stop"() : () -> ()
    %c0_11 = arith.constant 0 : index
    %c0_12 = arith.constant 0 : index
    %c0_13 = arith.constant 0 : index
    %13 = vector.load %arg4[%c0_11, %c0_12, %c0_13] : memref<4x1x96xf32, #tpu.memory_space<vmem>>, vector<4x1x96xf32>
    %14 = vector.broadcast %13 : vector<4x1x96xf32> to vector<4x8x96xf32>
    %15 = arith.addf %12, %14 : vector<4x8x96xf32>
    %16 = vector.extract_strided_slice %15 {offsets = [0, 0, 0], sizes = [4, 8, 32], strides = [1, 1, 1]} : vector<4x8x96xf32> to vector<4x8x32xf32>
    %17 = arith.truncf %16 : vector<4x8x32xf32> to vector<4x8x32xbf16>
    %18 = vector.extract_strided_slice %15 {offsets = [0, 0, 32], sizes = [4, 8, 32], strides = [1, 1, 1]} : vector<4x8x96xf32> to vector<4x8x32xf32>
    %19 = arith.truncf %18 : vector<4x8x32xf32> to vector<4x8x32xbf16>
    %20 = vector.extract_strided_slice %15 {offsets = [0, 0, 64], sizes = [4, 8, 32], strides = [1, 1, 1]} : vector<4x8x96xf32> to vector<4x8x32xf32>
    %21 = arith.truncf %20 : vector<4x8x32xf32> to vector<4x8x32xbf16>
    "tpu.trace_start"() <{level = 10 : i32, message = "hqd,hkd->hqk"}> : () -> ()
    %cst_14 = arith.constant dense<0.000000e+00> : vector<4x8x8xf32>
    %22 = tpu.matmul %17, %19, %cst_14 {dimension_numbers = #tpu.dot_dimension_numbers<[2], [2], [1], [1], [0, 0, 0, 1, 1, 1], [0], [0]>} : vector<4x8x32xbf16>, vector<4x8x32xbf16>, vector<4x8x8xf32> -> vector<4x8x8xf32>
    "tpu.trace_stop"() : () -> ()
    %23 = vector.broadcast %7 : vector<1x1x8xf32> to vector<4x8x8xf32>
    %24 = arith.addf %22, %23 : vector<4x8x8xf32>
    %cst_15 = arith.constant dense<0xFF800000> : vector<4x8xf32>
    %25 = vector.multi_reduction <maximumf>, %24, %cst_15 [2] : vector<4x8x8xf32> to vector<4x8xf32>
    %26 = vector.shape_cast %25 : vector<4x8xf32> to vector<4x8x1xf32>
    %27 = vector.broadcast %26 : vector<4x8x1xf32> to vector<4x8x8xf32>
    %28 = arith.subf %24, %27 : vector<4x8x8xf32>
    %29 = math.exp %28 : vector<4x8x8xf32>
    %cst_16 = arith.constant dense<0.000000e+00> : vector<4x8xf32>
    %30 = vector.multi_reduction <add>, %29, %cst_16 [2] : vector<4x8x8xf32> to vector<4x8xf32>
    %31 = vector.shape_cast %30 : vector<4x8xf32> to vector<4x8x1xf32>
    %32 = tpu.reciprocal %31 {approx = true} : vector<4x8x1xf32> -> vector<4x8x1xf32>
    %33 = vector.broadcast %32 : vector<4x8x1xf32> to vector<4x8x8xf32>
    %34 = arith.mulf %29, %33 : vector<4x8x8xf32>
    %35 = arith.truncf %34 : vector<4x8x8xf32> to vector<4x8x8xbf16>
    "tpu.trace_start"() <{level = 10 : i32, message = "hqk,hkd->hqd"}> : () -> ()
    %cst_17 = arith.constant dense<0.000000e+00> : vector<4x8x32xf32>
    %36 = tpu.matmul %35, %21, %cst_17 {dimension_numbers = #tpu.dot_dimension_numbers<[2], [1], [1], [2], [0, 0, 0, 1, 1, 2], [0], [0]>} : vector<4x8x8xbf16>, vector<4x8x32xbf16>, vector<4x8x32xf32> -> vector<4x8x32xf32>
    "tpu.trace_stop"() : () -> ()
    %37 = arith.truncf %36 : vector<4x8x32xf32> to vector<4x8x32xbf16>
    %c0_18 = arith.constant 0 : index
    %c0_19 = arith.constant 0 : index
    %c0_20 = arith.constant 0 : index
    %38 = vector.load %arg5[%c0_18, %c0_19, %c0_20] : memref<4x32x128xbf16, #tpu.memory_space<vmem>>, vector<4x32x128xbf16>
    "tpu.trace_start"() <{level = 10 : i32, message = "hld,hdk->hlk"}> : () -> ()
    %cst_21 = arith.constant dense<0.000000e+00> : vector<4x8x128xf32>
    %39 = tpu.matmul %37, %38, %cst_21 {dimension_numbers = #tpu.dot_dimension_numbers<[2], [1], [1], [2], [0, 0, 0, 1, 1, 2], [0], [0]>} : vector<4x8x32xbf16>, vector<4x32x128xbf16>, vector<4x8x128xf32> -> vector<4x8x128xf32>
    "tpu.trace_stop"() : () -> ()
    %cst_22 = arith.constant dense<0.000000e+00> : vector<8x128xf32>
    %40 = vector.multi_reduction <add>, %39, %cst_22 [0] : vector<4x8x128xf32> to vector<8x128xf32>
    %c0_23 = arith.constant 0 : index
    %c0_24 = arith.constant 0 : index
    %41 = vector.load %arg6[%c0_23, %c0_24] : memref<1x128xf32, #tpu.memory_space<vmem>>, vector<1x128xf32>
    %42 = vector.broadcast %41 : vector<1x128xf32> to vector<8x128xf32>
    %43 = arith.addf %40, %42 : vector<8x128xf32>
    %44 = arith.addf %43, %1 : vector<8x128xf32>
    %c0_25 = arith.constant 0 : index
    %c0_26 = arith.constant 0 : index
    %45 = vector.load %arg7[%c0_25, %c0_26] : memref<1x128xf32, #tpu.memory_space<vmem>>, vector<1x128xf32>
    %c0_27 = arith.constant 0 : index
    %c0_28 = arith.constant 0 : index
    %46 = vector.load %arg8[%c0_27, %c0_28] : memref<1x128xf32, #tpu.memory_space<vmem>>, vector<1x128xf32>
    %cst_29 = arith.constant dense<0.000000e+00> : vector<8xf32>
    %47 = vector.multi_reduction <add>, %44, %cst_29 [1] : vector<8x128xf32> to vector<8xf32>
    %48 = vector.shape_cast %47 : vector<8xf32> to vector<8x1xf32>
    %cst_30 = arith.constant 1.280000e+02 : f32
    %49 = vector.broadcast %cst_30 : f32 to vector<8x1xf32>
    %50 = arith.divf %48, %49 : vector<8x1xf32>
    %51 = arith.mulf %44, %44 : vector<8x128xf32>
    %cst_31 = arith.constant dense<0.000000e+00> : vector<8xf32>
    %52 = vector.multi_reduction <add>, %51, %cst_31 [1] : vector<8x128xf32> to vector<8xf32>
    %53 = vector.shape_cast %52 : vector<8xf32> to vector<8x1xf32>
    %cst_32 = arith.constant 1.280000e+02 : f32
    %54 = vector.broadcast %cst_32 : f32 to vector<8x1xf32>
    %55 = arith.divf %53, %54 : vector<8x1xf32>
    %56 = arith.mulf %50, %50 : vector<8x1xf32>
    %57 = arith.subf %55, %56 : vector<8x1xf32>
    %58 = vector.broadcast %50 : vector<8x1xf32> to vector<8x128xf32>
    %59 = arith.subf %44, %58 : vector<8x128xf32>
    %cst_33 = arith.constant 9.99999974E-6 : f32
    %60 = vector.broadcast %cst_33 : f32 to vector<8x1xf32>
    %61 = arith.addf %57, %60 : vector<8x1xf32>
    %62 = math.rsqrt %61 : vector<8x1xf32>
    %63 = vector.broadcast %62 : vector<8x1xf32> to vector<8x128xf32>
    %64 = arith.mulf %59, %63 : vector<8x128xf32>
    %65 = vector.broadcast %45 : vector<1x128xf32> to vector<8x128xf32>
    %66 = arith.mulf %64, %65 : vector<8x128xf32>
    %67 = vector.broadcast %46 : vector<1x128xf32> to vector<8x128xf32>
    %68 = arith.addf %66, %67 : vector<8x128xf32>
    %69 = arith.truncf %68 : vector<8x128xf32> to vector<8x128xbf16>
    %c0_34 = arith.constant 0 : index
    %c0_35 = arith.constant 0 : index
    %70 = vector.load %arg9[%c0_34, %c0_35] : memref<128x256xbf16, #tpu.memory_space<vmem>>, vector<128x256xbf16>
    %cst_36 = arith.constant dense<0.000000e+00> : vector<8x256xf32>
    %71 = tpu.matmul %69, %70, %cst_36 {dimension_numbers = #tpu.dot_dimension_numbers<[1], [0], [0], [1], [0, 0, 1, 1], [], []>} : vector<8x128xbf16>, vector<128x256xbf16>, vector<8x256xf32> -> vector<8x256xf32>
    %c0_37 = arith.constant 0 : index
    %c0_38 = arith.constant 0 : index
    %72 = vector.load %arg10[%c0_37, %c0_38] : memref<1x256xf32, #tpu.memory_space<vmem>>, vector<1x256xf32>
    %73 = vector.broadcast %72 : vector<1x256xf32> to vector<8x256xf32>
    %74 = arith.addf %71, %73 : vector<8x256xf32>
    %cst_39 = arith.constant 0.000000e+00 : f32
    %75 = vector.broadcast %cst_39 : f32 to vector<8x256xf32>
    %76 = arith.maximumf %74, %75 : vector<8x256xf32>
    %77 = arith.truncf %76 : vector<8x256xf32> to vector<8x256xbf16>
    %c0_40 = arith.constant 0 : index
    %c0_41 = arith.constant 0 : index
    %78 = vector.load %arg11[%c0_40, %c0_41] : memref<256x128xbf16, #tpu.memory_space<vmem>>, vector<256x128xbf16>
    %cst_42 = arith.constant dense<0.000000e+00> : vector<8x128xf32>
    %79 = tpu.matmul %77, %78, %cst_42 {dimension_numbers = #tpu.dot_dimension_numbers<[1], [0], [0], [1], [0, 0, 1, 1], [], []>} : vector<8x256xbf16>, vector<256x128xbf16>, vector<8x128xf32> -> vector<8x128xf32>
    %c0_43 = arith.constant 0 : index
    %c0_44 = arith.constant 0 : index
    %80 = vector.load %arg12[%c0_43, %c0_44] : memref<1x128xf32, #tpu.memory_space<vmem>>, vector<1x128xf32>
    %81 = vector.broadcast %80 : vector<1x128xf32> to vector<8x128xf32>
    %82 = arith.addf %79, %81 : vector<8x128xf32>
    %83 = arith.addf %82, %68 : vector<8x128xf32>
    %c0_45 = arith.constant 0 : index
    %c0_46 = arith.constant 0 : index
    %84 = vector.load %arg13[%c0_45, %c0_46] : memref<1x128xf32, #tpu.memory_space<vmem>>, vector<1x128xf32>
    %c0_47 = arith.constant 0 : index
    %c0_48 = arith.constant 0 : index
    %85 = vector.load %arg14[%c0_47, %c0_48] : memref<1x128xf32, #tpu.memory_space<vmem>>, vector<1x128xf32>
    %cst_49 = arith.constant dense<0.000000e+00> : vector<8xf32>
    %86 = vector.multi_reduction <add>, %83, %cst_49 [1] : vector<8x128xf32> to vector<8xf32>
    %87 = vector.shape_cast %86 : vector<8xf32> to vector<8x1xf32>
    %cst_50 = arith.constant 1.280000e+02 : f32
    %88 = vector.broadcast %cst_50 : f32 to vector<8x1xf32>
    %89 = arith.divf %87, %88 : vector<8x1xf32>
    %90 = arith.mulf %83, %83 : vector<8x128xf32>
    %cst_51 = arith.constant dense<0.000000e+00> : vector<8xf32>
    %91 = vector.multi_reduction <add>, %90, %cst_51 [1] : vector<8x128xf32> to vector<8xf32>
    %92 = vector.shape_cast %91 : vector<8xf32> to vector<8x1xf32>
    %cst_52 = arith.constant 1.280000e+02 : f32
    %93 = vector.broadcast %cst_52 : f32 to vector<8x1xf32>
    %94 = arith.divf %92, %93 : vector<8x1xf32>
    %95 = arith.mulf %89, %89 : vector<8x1xf32>
    %96 = arith.subf %94, %95 : vector<8x1xf32>
    %97 = vector.broadcast %89 : vector<8x1xf32> to vector<8x128xf32>
    %98 = arith.subf %83, %97 : vector<8x128xf32>
    %cst_53 = arith.constant 9.99999974E-6 : f32
    %99 = vector.broadcast %cst_53 : f32 to vector<8x1xf32>
    %100 = arith.addf %96, %99 : vector<8x1xf32>
    %101 = math.rsqrt %100 : vector<8x1xf32>
    %102 = vector.broadcast %101 : vector<8x1xf32> to vector<8x128xf32>
    %103 = arith.mulf %98, %102 : vector<8x128xf32>
    %104 = vector.broadcast %84 : vector<1x128xf32> to vector<8x128xf32>
    %105 = arith.mulf %103, %104 : vector<8x128xf32>
    %106 = vector.broadcast %85 : vector<1x128xf32> to vector<8x128xf32>
    %107 = arith.addf %105, %106 : vector<8x128xf32>
    %c0_54 = arith.constant 0 : index
    %c0_55 = arith.constant 0 : index
    %c0_56 = arith.constant 0 : index
    %108 = vector.load %arg15[%c0_54, %c0_55, %c0_56] : memref<1x8x128xf32, #tpu.memory_space<vmem>>, vector<1x8x128xf32>
    %109 = vector.shape_cast %108 : vector<1x8x128xf32> to vector<8x128xf32>
    %110 = vector.shape_cast %107 : vector<8x128xf32> to vector<1x8x128xf32>
    tpu.vector_store %arg15[%c0_54, %c0_55, %c0_56], %110 {strides = array<i32>} : memref<1x8x128xf32, #tpu.memory_space<vmem>>, vector<1x8x128xf32>,
    return
  }
  func.func @transform_0(%arg0: i32) -> (i32, i32, i32) {
    %c0_i32 = arith.constant 0 : i32
    %c0_i32_0 = arith.constant 0 : i32
    %c0_i32_1 = arith.constant 0 : i32
    return %arg0, %c0_i32, %c0_i32_0 : i32, i32, i32
  }
  func.func @transform_1(%arg0: i32) -> (i32, i32, i32) {
    %c0_i32 = arith.constant 0 : i32
    %c0_i32_0 = arith.constant 0 : i32
    %c0_i32_1 = arith.constant 0 : i32
    return %arg0, %c0_i32, %c0_i32_0 : i32, i32, i32
  }
  func.func @transform_2(%arg0: i32) -> (i32, i32, i32) {
    %c0_i32 = arith.constant 0 : i32
    %c0_i32_0 = arith.constant 0 : i32
    %c0_i32_1 = arith.constant 0 : i32
    %c0_i32_2 = arith.constant 0 : i32
    return %c0_i32, %c0_i32_0, %c0_i32_1 : i32, i32, i32
  }
  func.func @transform_3(%arg0: i32) -> (i32, i32, i32) {
    %c0_i32 = arith.constant 0 : i32
    %c0_i32_0 = arith.constant 0 : i32
    %c0_i32_1 = arith.constant 0 : i32
    %c0_i32_2 = arith.constant 0 : i32
    return %c0_i32, %c0_i32_0, %c0_i32_1 : i32, i32, i32
  }
  func.func @transform_4(%arg0: i32) -> (i32, i32, i32) {
    %c0_i32 = arith.constant 0 : i32
    %c0_i32_0 = arith.constant 0 : i32
    %c0_i32_1 = arith.constant 0 : i32
    %c0_i32_2 = arith.constant 0 : i32
    return %c0_i32, %c0_i32_0, %c0_i32_1 : i32, i32, i32
  }
  func.func @transform_5(%arg0: i32) -> (i32, i32) {
    %c0_i32 = arith.constant 0 : i32
    %c0_i32_0 = arith.constant 0 : i32
    %c0_i32_1 = arith.constant 0 : i32
    return %c0_i32, %c0_i32_0 : i32, i32
  }
  func.func @transform_6(%arg0: i32) -> (i32, i32) {
    %c0_i32 = arith.constant 0 : i32
    %c0_i32_0 = arith.constant 0 : i32
    %c0_i32_1 = arith.constant 0 : i32
    return %c0_i32, %c0_i32_0 : i32, i32
  }
  func.func @transform_7(%arg0: i32) -> (i32, i32) {
    %c0_i32 = arith.constant 0 : i32
    %c0_i32_0 = arith.constant 0 : i32
    %c0_i32_1 = arith.constant 0 : i32
    return %c0_i32, %c0_i32_0 : i32, i32
  }
  func.func @transform_8(%arg0: i32) -> (i32, i32) {
    %c0_i32 = arith.constant 0 : i32
    %c0_i32_0 = arith.constant 0 : i32
    %c0_i32_1 = arith.constant 0 : i32
    return %c0_i32, %c0_i32_0 : i32, i32
  }
  func.func @transform_9(%arg0: i32) -> (i32, i32) {
    %c0_i32 = arith.constant 0 : i32
    %c0_i32_0 = arith.constant 0 : i32
    %c0_i32_1 = arith.constant 0 : i32
    return %c0_i32, %c0_i32_0 : i32, i32
  }
  func.func @transform_10(%arg0: i32) -> (i32, i32) {
    %c0_i32 = arith.constant 0 : i32
    %c0_i32_0 = arith.constant 0 : i32
    %c0_i32_1 = arith.constant 0 : i32
    return %c0_i32, %c0_i32_0 : i32, i32
  }
  func.func @transform_11(%arg0: i32) -> (i32, i32) {
    %c0_i32 = arith.constant 0 : i32
    %c0_i32_0 = arith.constant 0 : i32
    %c0_i32_1 = arith.constant 0 : i32
    return %c0_i32, %c0_i32_0 : i32, i32
  }
  func.func @transform_12(%arg0: i32) -> (i32, i32) {
    %c0_i32 = arith.constant 0 : i32
    %c0_i32_0 = arith.constant 0 : i32
    %c0_i32_1 = arith.constant 0 : i32
    return %c0_i32, %c0_i32_0 : i32, i32
  }
  func.func @transform_13(%arg0: i32) -> (i32, i32) {
    %c0_i32 = arith.constant 0 : i32
    %c0_i32_0 = arith.constant 0 : i32
    %c0_i32_1 = arith.constant 0 : i32
    return %c0_i32, %c0_i32_0 : i32, i32
  }
  func.func @transform_14(%arg0: i32) -> (i32, i32, i32) {
    %c0_i32 = arith.constant 0 : i32
    %c0_i32_0 = arith.constant 0 : i32
    %c0_i32_1 = arith.constant 0 : i32
    return %arg0, %c0_i32, %c0_i32_0 : i32, i32, i32
  }
}

</mosaic_0001>

<bundles_post_ra>
// kernel: tpu_custom_call.1
= control target key start
LH: loop header
LB: loop body
LE: loop exit
PB: predicated region body
PF: predicated region fallthrough
CT: control target
= control target key end

     0   :  { %19 = vsyncpa [#allocation3], 0  ;;  %s2676_s0 = inlined_call_operand.vmem [shape: f32[2,8,128], index: 0, kind: input, shape index: {}]   ;;  %s2677_s1 = inlined_call_operand.vmem [shape: f32[2,1,8], index: 1, kind: input, shape index: {}]   ;;  %s2678_s2 = inlined_call_operand.vmem [shape: bf16[4,128,96], index: 2, kind: input, shape index: {}]   ;;  %s2679_s3 = inlined_call_operand.vmem [shape: f32[4,1,96], index: 3, kind: input, shape index: {}]   ;;  %s2680_s4 = inlined_call_operand.vmem [shape: bf16[4,32,128], index: 4, kind: input, shape index: {}]   ;;  %s2681_s5 = inlined_call_operand.vmem [shape: f32[1,128], index: 5, kind: input, shape index: {}]   ;;  %s2682_s6 = inlined_call_operand.vmem [shape: f32[1,128], index: 6, kind: input, shape index: {}]   ;;  %s2683_s7 = inlined_call_operand.vmem [shape: f32[1,128], index: 7, kind: input, shape index: {}]   ;;  %s2684_s8 = inlined_call_operand.vmem [shape: bf16[128,256], index: 8, kind: input, shape index: {}]   ;;  %s2685_s9 = inlined_call_operand.vmem [shape: f32[1,256], index: 9, kind: input, shape index: {}]   ;;  %s2686_s10 = inlined_call_operand.vmem [shape: bf16[256,128], index: 10, kind: input, shape index: {}]   ;;  %s2687_s11 = inlined_call_operand.vmem [shape: f32[1,128], index: 11, kind: input, shape index: {}]   ;;  %s2688_s12 = inlined_call_operand.vmem [shape: f32[1,128], index: 12, kind: input, shape index: {}]   ;;  %s2689_s13 = inlined_call_operand.vmem [shape: f32[1,128], index: 13, kind: input, shape index: {}]   ;;  %s2690_s14 = inlined_call_operand.hbm [shape: f32[2,8,128], index: 14, kind: output, shape index: {}]  }
   0x1   :  { %21 = vsyncpa [#allocation3 + $0x1], 0  ;;  %s2234_s29 = smov 0   ;;  %s2236_s30 = smov 0  }
   0x2   :  { %s2238_s15 = smov 0   ;;  %s2240_s16 = smov 0  }
   0x3 LB: > { %2697 = sst [smem:[#allocation5_spill]] %s2141_s29  ;;  %s2255_s17 = sadd.s32 4294967295, %s2153_s16   ;;  %s2153_s16 = sphi %s2240_s16, %s2708_s16   ;;  %s2149_s15 = sphi %s2238_s15, %s2710_s15   ;;  %s2145_s30 = sphi %s2236_s30, %s2712_s30   ;;  %s2141_s29 = sphi %s2234_s29, %s2711_s29  }
   0x4   : > { %2698 = sst [smem:[#allocation6_spill]] %s2149_s15  ;;  %s1634_s18 = sadd.s32 4294967294, %s2153_s16  }
   0x5   : > { %2699 = sst [smem:[#allocation7_spill]] %s2153_s16  ;;  %s2259_s19 = sadd.s32 1, %s2153_s16  }
   0x6   : > { %2700 = sst [smem:[#allocation8_spill]] %s2259_s19  ;;  %s338_s20 = sadd.s32 1, %s2149_s15 }
   0x7   : > { %s335_s21 = ssub.s32 %s2153_s16, %s2259_s19  ;;  %p348_p0 = scmp.ne.s32.totalorder %s2149_s15, %s2145_s30 }
   0x8   : > { %p336_p1 = scmp.eq.s32.totalorder %s335_s21, 0  ;;  %p349_p2 = scmp.eq.s32.totalorder %s2255_s17, 1 }
   0x9   : > { %p354_p3 = scmp.ne.s32.totalorder %s2145_s30, %s2141_s29  ;;  %p355_p4 = scmp.eq.s32.totalorder %s1634_s18, 1 }
   0xa   : > { %s2270_s22 = scalar_select %p336_p1, %s2149_s15, %s338_s20  }
   0xb   : > { %p2272_p5 = por %p349_p2, %p348_p0  ;;  %p2276_p6 = por %p355_p4, %p354_p3 }
   0xc   : > { %2701 = sst [smem:[#allocation9_spill]] %s2270_s22  ;;  %p1637_p7 = scmp.ge.s32.totalorder %s2153_s16, 1 }
   0xd   : > { %s2703_s24 = scalar_select %p2276_p6, 1, 0 }
   0xe   : > { %p422_p8 = scmp.lt.s32.totalorder %s2153_s16, 3 }
   0xf   : > { %2704 = sst [smem:[#allocation10_spill]] %s2703_s24 }
  0x10   : > { %p423_p9 = pnand %p1637_p7, %p422_p8 }
  0x11   : > { %p470_p10 = scmp.lt.s32.totalorder (!%p423_p9), %s2255_s17, 1  ;;  %s2155_s18 = smov (!%p423_p9), 96  }
  0x12   : > { %426 = sbr.rel (%p423_p9) target bundleno = 1566 (0x61e), region = 76  ;;  %s467_s26 = sand.u32 (!%p423_p9), 1, %s2145_s30  }
  0x13   : > { %s1638_s27 = sshll.u32 (!%p423_p9), %s467_s26, 3  ;;  %s1941_s28 = sshll.u32 (!%p423_p9), %s2255_s17, 3 }
  0x14   : > { %s1551_s24 = scalar_lea.sflag (!%p423_p9), [#allocation3], %s467_s26 }
  0x17   : > { %v1951_v0 = vld [vmem:[%s2678_s2 + $0x38] sm:$0xff]  ;;  %v1950_v4 = vld [vmem:[%s2678_s2 + $0x30] sm:$0xff]  ;;  %v1949_v8 = vld [vmem:[%s2678_s2 + $0x28] sm:$0xff]  ;;  %s2344_s25 = scalar_select %p470_p10, %s2255_s17, 1  ;;  %vm819_vm0 = vcmask 261120   ;;  %vm911_vm2 = vcmask 64512  }
  0x18   : > { %v1967_v1 = vld [vmem:[%s2678_s2 + $0xb8] sm:$0xff]  ;;  %611 = vmatpush.bf16.msra.mxu0 %v1951_v0  ;;  %v1966_v5 = vld [vmem:[%s2678_s2 + $0xb0] sm:$0xff]  ;;  %v1965_v9 = vld [vmem:[%s2678_s2 + $0xa8] sm:$0xff]  ;;  %vm965_vm3 = vcmask 1043456   ;;  %s469_s17 = scalar_lea.vmem [#allocation2], %s1638_s27 }
  0x19   : > { %v1975_v2 = vld [vmem:[%s2678_s2 + $0xf8] sm:$0xff]  ;;  %733 = vmatpush.bf16.msra.mxu2 %v1967_v1  ;;  %v1974_v6 = vld [vmem:[%s2678_s2 + $0xf0] sm:$0xff]  ;;  %v1973_v10 = vld [vmem:[%s2678_s2 + $0xe8] sm:$0xff]  ;;  %s1639_s21 = sshll.u32 %s2344_s25, 3  ;;  %s1563_s15 = sshll.u32 %s469_s17, 4  ;;  %s1564_s15 = int_to_ptr.vmem [resolvable:$true] %s1563_s15 }
  0x1a   : > { %v1959_v3 = vld [vmem:[%s2678_s2 + $0x78] sm:$0xff]  ;;  %794 = vmatpush.bf16.msra.mxu3 %v1975_v2  ;;  %v1958_v7 = vld [vmem:[%s2678_s2 + $0x70] sm:$0xff]  ;;  %v1957_v11 = vld [vmem:[%s2678_s2 + $0x68] sm:$0xff]  ;;  %s473_s16 = scalar_lea.vmem %s2676_s0, %s1639_s21  ;;  %s476_s21 = scalar_lea.vmem %s2677_s1, %s2344_s25 }
  0x1b   : > { %672 = vmatpush.bf16.msra.mxu1 %v1959_v3  ;;  %v1948_v12 = vld [vmem:[%s2678_s2 + $0x20] sm:$0xff]  ;;  %v1947_v16 = vld [vmem:[%s2678_s2 + $0x18] sm:$0xff]  ;;  %v1946_v20 = vld [vmem:[%s2678_s2 + $0x10] sm:$0xff]  ;;  %s2157_s25 = smov 64  }
  0x1c   : > { %612 = vmatpush.bf16.msra.mxu0 %v1950_v4  ;;  %v1964_v13 = vld [vmem:[%s2678_s2 + $0xa0] sm:$0xff]  ;;  %v1963_v17 = vld [vmem:[%s2678_s2 + $0x98] sm:$0xff]  ;;  %v1962_v21 = vld [vmem:[%s2678_s2 + $0x90] sm:$0xff] }
  0x1d   : > { %734 = vmatpush.bf16.msra.mxu2 %v1966_v5  ;;  %v1972_v14 = vld [vmem:[%s2678_s2 + $0xe0] sm:$0xff]  ;;  %v1971_v18 = vld [vmem:[%s2678_s2 + $0xd8] sm:$0xff]  ;;  %v1970_v22 = vld [vmem:[%s2678_s2 + $0xd0] sm:$0xff] }
  0x1e   : > { %795 = vmatpush.bf16.msra.mxu3 %v1974_v6  ;;  %v1956_v15 = vld [vmem:[%s2678_s2 + $0x60] sm:$0xff]  ;;  %v1955_v19 = vld [vmem:[%s2678_s2 + $0x58] sm:$0xff]  ;;  %v1954_v23 = vld [vmem:[%s2678_s2 + $0x50] sm:$0xff] }
  0x1f   : > { %673 = vmatpush.bf16.msra.mxu1 %v1958_v7  ;;  %v1945_v24 = vld [vmem:[%s2678_s2 + $0x8] sm:$0xff]  ;;  %v1944_v28 = vld [vmem:[%s2678_s2] sm:$0xff]  ;;  %v2156_v7 = vmov 0.0  }
  0x20   : > { %613 = vmatpush.bf16.msra.mxu0 %v1949_v8  ;;  %v1961_v25 = vld [vmem:[%s2678_s2 + $0x88] sm:$0xff]  ;;  %v1960_v29 = vld [vmem:[%s2678_s2 + $0x80] sm:$0xff] }
  0x21   : > { %735 = vmatpush.bf16.msra.mxu2 %v1965_v9  ;;  %v1969_v26 = vld [vmem:[%s2678_s2 + $0xc8] sm:$0xff]  ;;  %v2380_v30 = vld [vmem:[%s473_s16] sm:$0xff] }
  0x22   : > { %796 = vmatpush.bf16.msra.mxu3 %v1973_v10  ;;  %v1953_v27 = vld [vmem:[%s2678_s2 + $0x48] sm:$0xff]  ;;  %v1968_v31 = vld [vmem:[%s2678_s2 + $0xc0] sm:$0xff]  ;;  %v482_v33 = vpack.c.bf16 %v2380_v30, %v2380_v30 }
  0x23   : > { %674 = vmatpush.bf16.msra.mxu1 %v1957_v11  ;;  %v1952_v32 = vld [vmem:[%s2678_s2 + $0x40] sm:$0xff] }
  0x24   : > { %614 = vmatpush.bf16.msra.mxu0 %v1948_v12  ;;  %v2059_v34 = vld [vmem:[%s2679_s3] ss:$0 sm:$0xff]  ;;  %v2060_v35 = vld [vmem:[%s2679_s3 + $0x1] ss:$0 sm:$0xff]  ;;  %v2061_v41 = vld [vmem:[%s2679_s3 + $0x2] ss:$0 sm:$0xff] }
  0x25   : > { %736 = vmatpush.bf16.msra.mxu2 %v1964_v13  ;;  %v2062_v42 = vld [vmem:[%s2679_s3 + $0x3] ss:$0 sm:$0xff]  ;;  %v479_v6 = vld [vmem:[%s476_s21] sm:$0x1]  ;;  %s2111_s21 = scalar_lea.hbm %s2690_s14, 16 }
  0x26   : > { %797 = vmatpush.bf16.msra.mxu3 %v1972_v14  ;;  %vm480_vm1 = vcmp.eq.f32.partialorder %v479_v6, 0.0 }
  0x27   : > { %675 = vmatpush.bf16.msra.mxu1 %v1956_v15  ;;  %v481_v8 = vsel %vm480_vm1, -1e+09, %v2156_v7 }
  0x28   : > { %615 = vmatpush.bf16.msra.mxu0 %v1947_v16  ;;  %v812_v9 = vperm.slane %v481_v8, 0  ;;  %v1978_v8 = vld [vmem:[%s2680_s4 + $0x10] sm:$0xff] }
  0x29   : > { %737 = vmatpush.bf16.msra.mxu2 %v1963_v17 }
  0x2a   : > { %798 = vmatpush.bf16.msra.mxu3 %v1971_v18 }
  0x2b   : > { %676 = vmatpush.bf16.msra.mxu1 %v1955_v19 }
  0x2c   : > { %616 = vmatpush.bf16.msra.mxu0 %v1946_v20 }
  0x2d   : > { %738 = vmatpush.bf16.msra.mxu2 %v1962_v21 }
  0x2e   : > { %799 = vmatpush.bf16.msra.mxu3 %v1970_v22 }
  0x2f   : > { %677 = vmatpush.bf16.msra.mxu1 %v1954_v23 }
  0x30   : > { %617 = vmatpush.bf16.msra.mxu0 %v1945_v24 }
  0x31   : > { %739 = vmatpush.bf16.msra.mxu2 %v1961_v25 }
  0x32   : > { %800 = vmatpush.bf16.msra.mxu3 %v1969_v26 }
  0x33   : > { %678 = vmatpush.bf16.msra.mxu1 %v1953_v27 }
  0x34   : > { %618 = vmatpush.bf16.msra.mxu0 %v1944_v28 }
  0x35   : > { %740 = vmatpush.bf16.msra.mxu2 %v1960_v29 }
  0x36   : > { %801 = vmatpush.bf16.msra.mxu3 %v1968_v31 }
  0x37   : > { %679 = vmatpush.bf16.msra.mxu1 %v1952_v32  ;;  %619 = vmatmul.bf16.vlgmr.msra.gmra.mxu0 %v482_v33 }
  0x38   : > { %741 = vmatmul.bf16.vlgmr.msra.gmra.mxu2 %v482_v33 }
  0x39   : > { %802 = vmatmul.bf16.vlgmr.msra.gmra.mxu3 %v482_v33 }
  0x3a   : > { %680 = vmatmul.bf16.vlgmr.msra.gmra.mxu1 %v482_v33 }
  0xb4   : > { %v620_v36 = vpop.f32.mrf.mxu0 }
  0xb5   : > { %v621_v37 = vadd.f32 %v2059_v34, %v620_v36 }
  0xb7   : > { %v681_v38 = vpop.f32.mrf.mxu1  ;;  %v807_v40 = vpack.c.bf16 %v621_v37, %v621_v37 }
  0xb8   : > { %v682_v39 = vadd.f32 %v2060_v35, %v681_v38 }
  0xb9   : > { %v815_v44 = vunpack.c.l.b16 %v807_v40 }
  0xba   : > { %v808_v43 = vpack.c.bf16 %v682_v39, %v682_v39 }
  0xbb   : > { %v742_v45 = vpop.f32.mrf.mxu2  ;;  %v2402_v48 = vpack.c.b16 %v815_v44, %v815_v44 }
  0xbc   : > { %v743_v46 = vadd.f32 %v2061_v41, %v742_v45  ;;  %v803_v47 = vpop.f32.mrf.mxu3  ;;  %v622_v50 = vpop.f32.mrf.mxu0  ;;  %v840_v51 = vunpack.c.l.b16 %v808_v43 }
  0xbd   : > { %v804_v49 = vadd.f32 %v2062_v42, %v803_v47  ;;  %817 = vrot.lane.b32.xlu1 %v2402_v48, %s2155_s18 }
  0xbe   : > { %v809_v52 = vpack.c.bf16 %v743_v46, %v743_v46  ;;  %v841_v56 = vpack.c.b16 %v840_v51, %v840_v51 }
  0xbf   : > { %v683_v53 = vpop.f32.mrf.mxu1  ;;  %v810_v54 = vpack.c.bf16 %v804_v49, %v804_v49 }
  0xc0   : > { %v864_v55 = vunpack.c.l.b16 %v809_v52 }
  0xc1   : > { %v888_v59 = vunpack.c.l.b16 %v810_v54 }
  0xc2   : > { %v865_v57 = vpack.c.b16 %v864_v55, %v864_v55  ;;  %v1979_v55 = vld [vmem:[%s2680_s4 + $0x18] sm:$0xff] }
  0xc3   : > { %v744_v58 = vpop.f32.mrf.mxu2  ;;  %v889_v61 = vpack.c.b16 %v888_v59, %v888_v59 }
  0xc4   : > { %v805_v60 = vpop.f32.mrf.mxu3  ;;  %866 = vrot.lane.b32.xlu0 %v865_v57, %s2155_s18 }
  0xc5   : > { %842 = vrot.lane.b32.xlu1 %v841_v56, %s2155_s18 }
  0xcc   : > { %890 = vrot.lane.b32.xlu0 %v889_v61, %s2155_s18 }
 0x12f   : > { %v818_v62 = vpop.permute.xlu1 %817 }
 0x130   : > { %v824_v63 = vsel %vm819_vm0, %v818_v62, 0 }
 0x131   : > { %833 = vmatpush.bf16.xpose.msrb.mxu0 %v824_v63 }
 0x136   : > { %v867_v0 = vpop.permute.xlu0 %866 }
 0x137   : > { %v872_v1 = vsel %vm819_vm0, %v867_v0, 0  ;;  %v843_v2 = vpop.permute.xlu1 %842 }
 0x138   : > { %881 = vmatpush.bf16.xpose.msrb.mxu2 %v872_v1  ;;  %1768 = vmatmul.msk.bf16.vlgmr.msrb.gmra.mxu0 %vm819_vm0, %v807_v40  ;;  %v848_v3 = vsel %vm819_vm0, %v843_v2, 0 }
 0x139   : > { %857 = vmatpush.bf16.xpose.msrb.mxu1 %v848_v3 }
 0x13e   : > { %v891_v4 = vpop.permute.xlu0 %890 }
 0x13f   : > { %1770 = vmatmul.msk.bf16.vlgmr.msrb.gmra.mxu2 %vm819_vm0, %v809_v52  ;;  %v896_v5 = vsel %vm819_vm0, %v891_v4, 0 }
 0x140   : > { %905 = vmatpush.bf16.xpose.msrb.mxu3 %v896_v5  ;;  %1769 = vmatmul.msk.bf16.vlgmr.msrb.gmra.mxu1 %vm819_vm0, %v808_v43 }
 0x147   : > { %1771 = vmatmul.msk.bf16.vlgmr.msrb.gmra.mxu3 %vm819_vm0, %v810_v54 }
 0x1b5   : > { %v835_v10 = vpop.f32.mrf.mxu0 }
 0x1b6   : > { %v836_v11 = vadd.f32 %v835_v10, %v812_v9  ;;  %v1980_v10 = vld [vmem:[%s2680_s4 + $0x20] sm:$0xff] }
 0x1b8   : > { %v912_v12 = vsel %vm911_vm2, %v836_v11, -inf }
 0x1b9   : > { %913 = vmax.xlane.f32.xlu0 %v912_v12  ;;  %v1977_v12 = vld [vmem:[%s2680_s4 + $0x8] sm:$0xff] }
 0x1bd   : > { %v837_v13 = vpop.f32.mrf.mxu0  ;;  %v859_v14 = vpop.f32.mrf.mxu1 }
 0x1be   : > { %v860_v15 = vadd.f32 %v859_v14, %v812_v9  ;;  %v1982_v13 = vld [vmem:[%s2680_s4 + $0x30] sm:$0xff]  ;;  %v1976_v14 = vld [vmem:[%s2680_s4] sm:$0xff] }
 0x1c0   : > { %v915_v16 = vsel %vm911_vm2, %v860_v15, -inf }
 0x1c1   : > { %916 = vmax.xlane.f32.xlu1 %v915_v16 }
 0x1c2   : > { %v883_v17 = vpop.f32.mrf.mxu2 }
 0x1c3   : > { %v884_v18 = vadd.f32 %v883_v17, %v812_v9 }
 0x1c5   : > { %v918_v19 = vsel %vm911_vm2, %v884_v18, -inf  ;;  %v861_v20 = vpop.f32.mrf.mxu1 }
 0x1c6   : > { %919 = vmax.xlane.f32.xlu2 %v918_v19 }
 0x1ca   : > { %v885_v21 = vpop.f32.mrf.mxu2  ;;  %v907_v22 = vpop.f32.mrf.mxu3 }
 0x1cb   : > { %v908_v23 = vadd.f32 %v907_v22, %v812_v9  ;;  %v1981_v9 = vld [vmem:[%s2680_s4 + $0x28] sm:$0xff] }
 0x1cd   : > { %v921_v24 = vsel %vm911_vm2, %v908_v23, -inf }
 0x1ce   : > { %922 = vmax.xlane.f32.xlu2 %v921_v24 }
 0x1d2   : > { %v909_v25 = vpop.f32.mrf.mxu3 }
 0x1da   : > { %1024 = vrot.lane.b32.xlu1 %v889_v61, %s2157_s25 }
 0x1e2   : > { %982 = vrot.lane.b32.xlu1 %v841_v56, %s2157_s25 }
 0x1e6   : > { %1003 = vrot.lane.b32.xlu2 %v865_v57, %s2157_s25 }
 0x22c   : > { %v914_v34 = vpop.xlane.xlu0 %913 }
 0x22d   : > { %v924_v39 = vsub.f32 %v836_v11, %v914_v34  ;;  %v1983_v11 = vld [vmem:[%s2680_s4 + $0x38] sm:$0xff]  ;;  %v2063_v34 = vld [vmem:[%s2681_s5] ss:$0 sm:$0xff] }
 0x22f   : > { %v928_v42 = vmul.f32 1.442695, %v924_v39 }
 0x234   : > { %v917_v26 = vpop.xlane.xlu1 %916 }
 0x235   : > { %v925_v27 = vsub.f32 %v860_v15, %v917_v26 }
 0x237   : > { %v930_v28 = vmul.f32 1.442695, %v925_v27 }
 0x239   : > { %v920_v29 = vpop.xlane.xlu2 %919  ;;  %2069 = vpow2.f32 %v930_v28 }
 0x23a   : > { %v926_v31 = vsub.f32 %v884_v18, %v920_v29 }
 0x23c   : > { %v932_v32 = vmul.f32 1.442695, %v926_v31 }
 0x23e   : > { %2071 = vpow2.f32 %v932_v32 }
 0x23f   : > { %v2070_v33 = vpop.eup %2069 }
 0x240   : > { %v939_v36 = vsel %vm911_vm2, %v2070_v33, 0.0 }
 0x241   : > { %v923_v35 = vpop.xlane.xlu2 %922  ;;  %940 = vadd.xlane.f32.xlu0 %v939_v36 }
 0x242   : > { %v927_v37 = vsub.f32 %v908_v23, %v923_v35 }
 0x244   : > { %v2072_v38 = vpop.eup %2071  ;;  %v934_v40 = vmul.f32 1.442695, %v927_v37 }
 0x245   : > { %v942_v41 = vsel %vm911_vm2, %v2072_v38, 0.0 }
 0x246   : > { %2073 = vpow2.f32 %v934_v40  ;;  %943 = vadd.xlane.f32.xlu2 %v942_v41 }
 0x247   : > { %2075 = vpow2.f32 %v928_v42 }
 0x249   : > { %v1004_v43 = vpop.permute.xlu2 %1003 }
 0x24a   : > { %v1009_v44 = vsel %vm965_vm3, %v1004_v43, 0  ;;  %v1870_v43 = vld [vmem:[%s2684_s8 + $0x70] sm:$0xf] }
 0x24b   : > { %1018 = vmatpush.bf16.msra.mxu2 %v1009_v44  ;;  %v1999_v44 = vld [vmem:[%s2684_s8 + $0x74] sm:$0xf0] }
 0x24c   : > { %v2074_v45 = vpop.eup %2073  ;;  %v1025_v46 = vpop.permute.xlu1 %1024 }
 0x24d   : > { %v945_v47 = vsel %vm911_vm2, %v2074_v45, 0.0  ;;  %v1030_v49 = vsel %vm965_vm3, %v1025_v46, 0  ;;  %v2076_v50 = vpop.eup %2075  ;;  %v1872_v46 = vld [vmem:[%s2684_s8 + $0x78] sm:$0xf0] }
 0x24e   : > { %946 = vadd.xlane.f32.xlu2 %v945_v47  ;;  %1039 = vmatpush.bf16.msra.mxu3 %v1030_v49  ;;  %v936_v52 = vsel %vm911_vm2, %v2076_v50, 0.0  ;;  %v2158_v47 = vmov 128.0  }
 0x24f   : > { %1142 = vmatpush.bf16.msrb.mxu2 %v1981_v9 }
 0x252   : > { %1170 = vmatpush.bf16.msrb.mxu3 %v1983_v11 }
 0x253   : > { %1143 = vmatpush.bf16.msrb.mxu2 %v1980_v10  ;;  %v1840_v10 = vld [vmem:[%s2684_s8 + $0x38] sm:$0xf0] }
 0x254   : > { %v983_v51 = vpop.permute.xlu1 %982 }
 0x255   : > { %v988_v53 = vsel %vm965_vm3, %v983_v51, 0  ;;  %960 = vrot.lane.b32.xlu0 %v2402_v48, %s2157_s25  ;;  %v1997_v51 = vld [vmem:[%s2684_s8 + $0x64] sm:$0xf0]  ;;  %s1561_s25 = scalar_lea.hbm %s2690_s14, %s1941_s28 }
 0x256   : > { %937 = vadd.xlane.f32.xlu2 %v936_v52  ;;  %997 = vmatpush.bf16.msra.mxu1 %v988_v53  ;;  %v1996_v52 = vld [vmem:[%s2684_s8 + $0x64] sm:$0xf]  ;;  %s1565_s19 = sshll.u32 %s1561_s25, 4  ;;  %s1566_s19 = int_to_ptr.hbm [resolvable:$true] %s1565_s19 }
 0x257   : > { %1171 = vmatpush.bf16.msrb.mxu3 %v1982_v13  ;;  %v1830_v13 = vld [vmem:[%s2684_s8 + $0x20] sm:$0xf]  ;;  %s2105_s18 = sshra.s32 %s1566_s19, 4  ;;  %s2106_s18 = int_to_ptr.hbm [resolvable:$true] %s2105_s18 }
 0x258   : > { %s2107_s20 = scalar_lea.hbm %s2106_s18, 8  ;;  %p2112_p0 = scmp.lt.s32.totalorder %s2106_s18, %s2690_s14 }
 0x259   : > { %p2108_p11 = scmp.ne.s32.totalorder %s2106_s18, %s2107_s20  ;;  %p2113_p1 = scmp.lt.s32.totalorder %s2111_s21, %s2107_s20 }
 0x25a   : > { %1114 = vmatpush.bf16.msrb.mxu1 %v1979_v55 }
 0x25b   : > { %p2109_p12 = pnand %p2108_p11, %p2272_p5  ;;  %p2114_p2 = por %p2113_p1, %p2112_p0 }
 0x25d   : > { %p2110_p13 = pneg %p2109_p12 }
 0x25e   : > { %1115 = vmatpush.bf16.msrb.mxu1 %v1978_v8  ;;  %v1990_v8 = vld [vmem:[%s2684_s8 + $0x34] sm:$0xf] }
 0x25f   : > { %v1843_v11 = vor.u32 %v1990_v8, %v1840_v10  ;;  %p2115_p3 = pnand %p2114_p2, %p2110_p13 }
 0x2b4   : > { %v941_v54 = vpop.xlane.xlu0 %940 }
 0x2b5   : > { %2077 = vrcp.f32 %v941_v54  ;;  %v1864_v54 = vld [vmem:[%s2684_s8 + $0x68] sm:$0xf0] }
 0x2b6   : > { %v1867_v55 = vor.u32 %v1996_v52, %v1864_v54  ;;  %v2003_v52 = vld [vmem:[%s2686_s10 + $0x18] sm:$0xff] }
 0x2b9   : > { %v944_v56 = vpop.xlane.xlu2 %943 }
 0x2ba   : > { %2079 = vrcp.f32 %v944_v56 }
 0x2bb   : > { %v2078_v57 = vpop.eup %2077 }
 0x2bc   : > { %v953_v58 = vmul.f32 %v2078_v57, %v2070_v33  ;;  %v1854_v57 = vld [vmem:[%s2684_s8 + $0x50] sm:$0xf] }
 0x2be   : > { %v957_v59 = vpack.c.bf16 %v953_v58, %v953_v58  ;;  %v1995_v58 = vld [vmem:[%s2684_s8 + $0x54] sm:$0xf0] }
 0x2c0   : > { %v2080_v60 = vpop.eup %2079  ;;  %1773 = vmatmul.msk.bf16.vlgmr.msra.gmra.mxu1 %vm911_vm2, %v957_v59  ;;  %v1994_v59 = vld [vmem:[%s2684_s8 + $0x54] sm:$0xf] }
 0x2c1   : > { %v954_v61 = vmul.f32 %v2080_v60, %v2072_v38  ;;  %v947_v62 = vpop.xlane.xlu2 %946  ;;  %v1855_v60 = vor.u32 %v1995_v58, %v1854_v57  ;;  %v2010_v57 = vld [vmem:[%s2686_s10 + $0x50] sm:$0xff] }
 0x2c2   : > { %2081 = vrcp.f32 %v947_v62 }
 0x2c3   : > { %v958_v48 = vpack.c.bf16 %v954_v61, %v954_v61  ;;  %v1856_v61 = vld [vmem:[%s2684_s8 + $0x58] sm:$0xf0] }
 0x2c4   : > { %v1859_v62 = vor.u32 %v1994_v59, %v1856_v61  ;;  %v2064_v61 = vld [vmem:[%s2682_s6] ss:$0 sm:$0xff] }
 0x2c5   : > { %1774 = vmatmul.msk.bf16.vlgmr.msra.gmra.mxu2 %vm911_vm2, %v958_v48 }
 0x2c7   : > { %v961_v0 = vpop.permute.xlu0 %960 }
 0x2c8   : > { %v2082_v63 = vpop.eup %2081  ;;  %v967_v2 = vsel %vm965_vm3, %v961_v0, 0  ;;  %v1993_v0 = vld [vmem:[%s2684_s8 + $0x44] sm:$0xf0] }
 0x2c9   : > { %v955_v1 = vmul.f32 %v2082_v63, %v2074_v45  ;;  %v938_v3 = vpop.xlane.xlu2 %937  ;;  %976 = vmatpush.bf16.msra.mxu0 %v967_v2  ;;  %v1871_v45 = vor.u32 %v1999_v44, %v1870_v43  ;;  %v1846_v63 = vld [vmem:[%s2684_s8 + $0x40] sm:$0xf]  ;;  %v2006_v43 = vld [vmem:[%s2686_s10 + $0x30] sm:$0xff] }
 0x2ca   : > { %2083 = vrcp.f32 %v938_v3  ;;  %v1847_v2 = vor.u32 %v1993_v0, %v1846_v63  ;;  %v1848_v3 = vld [vmem:[%s2684_s8 + $0x48] sm:$0xf0]  ;;  %v2014_v44 = vld [vmem:[%s2686_s10 + $0x70] sm:$0xff]  ;;  %v2065_v63 = vld [vmem:[%s2683_s7] ss:$0 sm:$0xff] }
 0x2cb   : > { %v959_v4 = vpack.c.bf16 %v955_v1, %v955_v1  ;;  %2085 = vrcp.f32 %v2158_v47  ;;  %v1992_v1 = vld [vmem:[%s2684_s8 + $0x44] sm:$0xf] }
 0x2cc   : > { %v2004_v47 = vld [vmem:[%s2686_s10 + $0x20] sm:$0xff] }
 0x2cd   : > { %1775 = vmatmul.msk.bf16.vlgmr.msra.gmra.mxu3 %vm911_vm2, %v959_v4  ;;  %1086 = vmatpush.bf16.msrb.mxu0 %v1977_v12  ;;  %v1851_v4 = vor.u32 %v1992_v1, %v1848_v3  ;;  %v2009_v3 = vld [vmem:[%s2686_s10 + $0x48] sm:$0xff] }
 0x2d0   : > { %v2084_v5 = vpop.eup %2083 }
 0x2d1   : > { %v952_v6 = vmul.f32 %v2084_v5, %v2076_v50  ;;  %1087 = vmatpush.bf16.msrb.mxu0 %v1976_v14  ;;  %v1862_v50 = vld [vmem:[%s2684_s8 + $0x60] sm:$0xf]  ;;  %v2086_v56 = vpop.eup %2085  ;;  %v1989_v14 = vld [vmem:[%s2684_s8 + $0x24] sm:$0xf0] }
 0x2d2   : > { %v1863_v53 = vor.u32 %v1997_v51, %v1862_v50  ;;  %v1191_v48 = vmul.f32 128.0, %v2086_v56  ;;  %vm1195_vm4 = vweird.f32 %v2086_v56 }
 0x2d3   : > { %v956_v7 = vpack.c.bf16 %v952_v6, %v952_v6  ;;  %v1838_v6 = vld [vmem:[%s2684_s8 + $0x30] sm:$0xf] }
 0x2d4   : > { %v1192_v5 = vsub.f32 1.0, %v1191_v48 }
 0x2d5   : > { %1772 = vmatmul.msk.bf16.vlgmr.msra.gmra.mxu0 %vm911_vm2, %v956_v7  ;;  %v1991_v7 = vld [vmem:[%s2684_s8 + $0x34] sm:$0xf0] }
 0x2d6   : > { %1328 = vmatpush.bf16.msra.mxu0 %v1871_v45  ;;  %v1839_v9 = vor.u32 %v1991_v7, %v1838_v6  ;;  %v1193_v12 = vmul.f32 %v2086_v56, %v1192_v5  ;;  %v2005_v45 = vld [vmem:[%s2686_s10 + $0x28] sm:$0xff]  ;;  %v2008_v5 = vld [vmem:[%s2686_s10 + $0x40] sm:$0xff] }
 0x2d7   : > { %v1242_v6 = vld [vmem:[%s2685_s9] sm:$0x3] }
 0x2d8   : > { %v1244_v7 = vperm.slane %v1242_v6, 0  ;;  %v1245_v8 = vperm.slane %v1242_v6, 1 }
 0x2da   : > { %1329 = vmatpush.bf16.msra.mxu0 %v1863_v53  ;;  %v2011_v53 = vld [vmem:[%s2686_s10 + $0x58] sm:$0xff] }
 0x2de   : > { %1330 = vmatpush.bf16.msra.mxu0 %v1855_v60 }
 0x2e2   : > { %1331 = vmatpush.bf16.msra.mxu0 %v1847_v2 }
 0x2e6   : > { %1332 = vmatpush.bf16.msra.mxu0 %v1839_v9 }
 0x33d   : > { %v999_v15 = vpop.f32.mrf.mxu1 }
 0x33e   : > { %v1046_v16 = vpack.c.bf16 %v999_v15, %v999_v15  ;;  %v1988_v15 = vld [vmem:[%s2684_s8 + $0x24] sm:$0xf] }
 0x340   : > { %1793 = vmatmul.msk.bf16.vlgmr.msrb.gmra.mxu1 %vm819_vm0, %v1046_v16  ;;  %v1831_v16 = vor.u32 %v1989_v14, %v1830_v13 }
 0x342   : > { %1333 = vmatpush.bf16.msra.mxu0 %v1831_v16 }
 0x345   : > { %v1001_v17 = vpop.f32.mrf.mxu1 }
 0x346   : > { %v1832_v17 = vld [vmem:[%s2684_s8 + $0x28] sm:$0xf0] }
 0x348   : > { %v1020_v18 = vpop.f32.mrf.mxu2 }
 0x349   : > { %v1047_v19 = vpack.c.bf16 %v1020_v18, %v1020_v18  ;;  %v1835_v18 = vor.u32 %v1988_v15, %v1832_v17 }
 0x34b   : > { %1802 = vmatmul.msk.bf16.vlgmr.msrb.gmra.mxu2 %vm819_vm0, %v1047_v19  ;;  %v1194_v19 = vadd.f32 %v2086_v56, %v1193_v12 }
 0x350   : > { %v1022_v20 = vpop.f32.mrf.mxu2  ;;  %v1041_v21 = vpop.f32.mrf.mxu3 }
 0x351   : > { %v1048_v22 = vpack.c.bf16 %v1041_v21, %v1041_v21  ;;  %v1822_v20 = vld [vmem:[%s2684_s8 + $0x10] sm:$0xf]  ;;  %v1987_v21 = vld [vmem:[%s2684_s8 + $0x14] sm:$0xf0] }
 0x352   : > { %v978_v23 = vpop.f32.mrf.mxu0 }
 0x353   : > { %v1045_v24 = vpack.c.bf16 %v978_v23, %v978_v23  ;;  %1811 = vmatmul.msk.bf16.vlgmr.msrb.gmra.mxu3 %vm819_vm0, %v1048_v22  ;;  %v1986_v22 = vld [vmem:[%s2684_s8 + $0x14] sm:$0xf]  ;;  %v1823_v23 = vor.u32 %v1987_v21, %v1822_v20 }
 0x355   : > { %1784 = vmatmul.msk.bf16.vlgmr.msrb.gmra.mxu0 %vm819_vm0, %v1045_v24  ;;  %v1824_v24 = vld [vmem:[%s2684_s8 + $0x18] sm:$0xf0] }
 0x356   : > { %1334 = vmatpush.bf16.msra.mxu0 %v1823_v23 }
 0x358   : > { %v1043_v25 = vpop.f32.mrf.mxu3 }
 0x359   : > { %v1814_v25 = vld [vmem:[%s2684_s8] sm:$0xf] }
 0x35a   : > { %v980_v26 = vpop.f32.mrf.mxu0 }
 0x35b   : > { %v1985_v26 = vld [vmem:[%s2684_s8 + $0x4] sm:$0xf0] }
 0x3bd   : > { %v1117_v27 = vpop.f32.mrf.mxu1 }
 0x3c5   : > { %v1119_v28 = vpop.f32.mrf.mxu1 }
 0x3c6   : > { %v1984_v28 = vld [vmem:[%s2684_s8 + $0x4] sm:$0xf] }
 0x3ce   : > { %v1145_v29 = vpop.f32.mrf.mxu2 }
 0x3d2   : > { %v1089_v31 = vpop.f32.mrf.mxu0 }
 0x3d3   : > { %v1177_v32 = vadd.f32 %v1117_v27, %v1089_v31  ;;  %v1827_v27 = vor.u32 %v1986_v22, %v1824_v24  ;;  %v1815_v31 = vor.u32 %v1985_v26, %v1814_v25 }
 0x3d5   : > { %v1178_v33 = vadd.f32 %v1177_v32, %v1145_v29  ;;  %v1816_v29 = vld [vmem:[%s2684_s8 + $0x8] sm:$0xf0]  ;;  %v2571_v32 = vsel %vm1195_vm4, %v2086_v56, %v1194_v19  ;;  %1335 = vmatpush.bf16.msra.mxu0 %v1815_v31  ;;  %v2002_v56 = vld [vmem:[%s2686_s10 + $0x10] sm:$0xff]  ;;  %v2066_v19 = vld [vmem:[%s2687_s11] ss:$0 sm:$0xff] }
 0x3d6   : > { %v1147_v35 = vpop.f32.mrf.mxu2  ;;  %v1173_v36 = vpop.f32.mrf.mxu3 }
 0x3d7   : > { %v1179_v37 = vadd.f32 %v1178_v33, %v1173_v36  ;;  %v1819_v33 = vor.u32 %v1984_v28, %v1816_v29 }
 0x3d9   : > { %v1184_v38 = vadd.f32 %v2063_v34, %v1179_v37 }
 0x3da   : > { %v1091_v39 = vpop.f32.mrf.mxu0 }
 0x3db   : > { %v2470_v40 = vadd.f32 %v1184_v38, %v2380_v30  ;;  %v1998_v30 = vld [vmem:[%s2684_s8 + $0x74] sm:$0xf]  ;;  %v2007_v39 = vld [vmem:[%s2686_s10 + $0x38] sm:$0xff] }
 0x3dc   : > { %v1875_v49 = vor.u32 %v1998_v30, %v1872_v46  ;;  %1490 = vmatpush.bf16.msra.mxu2 %v2007_v39  ;;  %v2013_v46 = vld [vmem:[%s2686_s10 + $0x68] sm:$0xff] }
 0x3dd   : > { %1188 = vadd.xlane.f32.xlu0 %v2470_v40  ;;  %v1198_v41 = vmul.f32 %v2470_v40, %v2470_v40 }
 0x3de   : > { %v1175_v42 = vpop.f32.mrf.mxu3  ;;  %1341 = vmatpush.bf16.msra.mxu1 %v1875_v49  ;;  %v2012_v49 = vld [vmem:[%s2686_s10 + $0x60] sm:$0xff] }
 0x3df   : > { %1199 = vadd.xlane.f32.xlu1 %v1198_v41  ;;  %v2015_v41 = vld [vmem:[%s2686_s10 + $0x78] sm:$0xff] }
 0x3e0   : > { %1503 = vmatpush.bf16.msra.mxu3 %v2015_v41  ;;  %1491 = vmatpush.bf16.msra.mxu2 %v2006_v43 }
 0x3e2   : > { %1342 = vmatpush.bf16.msra.mxu1 %v1867_v55 }
 0x3e4   : > { %1504 = vmatpush.bf16.msra.mxu3 %v2014_v44  ;;  %1492 = vmatpush.bf16.msra.mxu2 %v2005_v45 }
 0x3e6   : > { %1343 = vmatpush.bf16.msra.mxu1 %v1859_v62 }
 0x3e8   : > { %1505 = vmatpush.bf16.msra.mxu3 %v2013_v46  ;;  %1493 = vmatpush.bf16.msra.mxu2 %v2004_v47  ;;  %v2068_v46 = vld [vmem:[%s2689_s13] ss:$0 sm:$0xff] }
 0x3ea   : > { %1344 = vmatpush.bf16.msra.mxu1 %v1851_v4  ;;  %v2000_v4 = vld [vmem:[%s2686_s10] sm:$0xff] }
 0x3ec   : > { %1506 = vmatpush.bf16.msra.mxu3 %v2012_v49  ;;  %1494 = vmatpush.bf16.msra.mxu2 %v2003_v52 }
 0x3ee   : > { %1345 = vmatpush.bf16.msra.mxu1 %v1843_v11 }
 0x3f0   : > { %1507 = vmatpush.bf16.msra.mxu3 %v2011_v53  ;;  %1495 = vmatpush.bf16.msra.mxu2 %v2002_v56 }
 0x3f2   : > { %1346 = vmatpush.bf16.msra.mxu1 %v1835_v18 }
 0x3f4   : > { %1508 = vmatpush.bf16.msra.mxu3 %v2010_v57 }
 0x3f6   : > { %1347 = vmatpush.bf16.msra.mxu1 %v1827_v27 }
 0x3f8   : > { %1509 = vmatpush.bf16.msra.mxu3 %v2009_v3 }
 0x3fa   : > { %1348 = vmatpush.bf16.msra.mxu1 %v1819_v33 }
 0x3fc   : > { %1510 = vmatpush.bf16.msra.mxu3 %v2008_v5 }
 0x450   : > { %v1189_v34 = vpop.xlane.xlu0 %1188 }
 0x451   : > { %v1197_v35 = vmul.f32 %v2571_v32, %v1189_v34 }
 0x452   : > { %v1200_v36 = vpop.xlane.xlu1 %1199 }
 0x453   : > { %v1202_v37 = vmul.f32 %v1197_v35, %v1197_v35  ;;  %v1201_v38 = vmul.f32 %v1200_v36, %v2571_v32  ;;  %v1204_v60 = vsub.f32 %v2470_v40, %v1197_v35  ;;  %v2001_v40 = vld [vmem:[%s2686_s10 + $0x8] sm:$0xff] }
 0x454   : > { %1496 = vmatpush.bf16.msra.mxu2 %v2001_v40 }
 0x455   : > { %v1203_v42 = vsub.f32 %v1201_v38, %v1202_v37 }
 0x457   : > { %v1205_v30 = vadd.f32 1e-05, %v1203_v42 }
 0x458   : > { %1497 = vmatpush.bf16.msra.mxu2 %v2000_v4 }
 0x459   : > { %2087 = vrsqrt.f32 %v1205_v30  ;;  %vm1212_vm6 = vweird.f32 %v1205_v30 }
 0x45f   : > { %v2088_v50 = vpop.eup %2087 }
 0x460   : > { %v1207_v51 = vmul.f32 %v2088_v50, %v1205_v30  ;;  %vm1213_vm5 = vweird.f32 %v2088_v50 }
 0x461   : > { %vm1214_vm7 = vmor %vm1212_vm6, %vm1213_vm5 }
 0x462   : > { %v1208_v54 = vmul.f32 %v2088_v50, %v1207_v51 }
 0x464   : > { %v1209_v55 = vmul.f32 0.5, %v1208_v54 }
 0x466   : > { %v1210_v58 = vsub.f32 1.5, %v1209_v55 }
 0x468   : > { %v1211_v59 = vmul.f32 %v2088_v50, %v1210_v58 }
 0x46a   : > { %v1215_v62 = vsel %vm1214_vm7, %v2088_v50, %v1211_v59 }
 0x46b   : > { %v1216_v48 = vmul.f32 %v1215_v62, %v1204_v60 }
 0x46d   : > { %v1220_v0 = vmul.f32 %v2064_v61, %v1216_v48 }
 0x46f   : > { %v1224_v1 = vadd.f32 %v2065_v63, %v1220_v0 }
 0x471   : > { %v1225_v2 = vpack.c.bf16 %v1224_v1, %v1224_v1 }
 0x473   : > { %1336 = vmatmul.bf16.vlgmr.msra.gmra.mxu0 %v1225_v2  ;;  %1349 = vmatmul.bf16.vlgmr.msra.gmra.mxu1 %v1225_v2 }
 0x4f0   : > { %v1337_v9 = vpop.f32.mrf.mxu0  ;;  %v1350_v10 = vpop.f32.mrf.mxu1 }
 0x4f1   : > { %v1338_v11 = vadd.f32 %v1337_v9, %v1244_v7  ;;  %v1351_v12 = vadd.f32 %v1350_v10, %v1245_v8 }
 0x4f3   : > { %v1354_v13 = vmax.f32 %v1338_v11, 0.0  ;;  %v1355_v14 = vmax.f32 %v1351_v12, 0.0 }
 0x4f5   : > { %v1356_v15 = vpack.c.bf16 %v1354_v13, %v1354_v13  ;;  %v1357_v16 = vpack.c.bf16 %v1355_v14, %v1355_v14 }
 0x4f7   : > { %1498 = vmatmul.bf16.vlgmr.msra.gmra.mxu2 %v1356_v15  ;;  %1511 = vmatmul.bf16.vlgmr.msra.gmra.mxu3 %v1357_v16 }
 0x4f8   : > { %v1339_v17 = vpop.f32.mrf.mxu0  ;;  %v1352_v18 = vpop.f32.mrf.mxu1 }
 0x57a   : > { %v1499_v20 = vpop.f32.mrf.mxu2  ;;  %v1512_v21 = vpop.f32.mrf.mxu3 }
 0x57b   : > { %v1500_v22 = vadd.f32 %v2066_v19, %v1499_v20 }
 0x57d   : > { %v1513_v23 = vadd.f32 %v1512_v21, %v1500_v22 }
 0x57f   : > { %v1516_v24 = vadd.f32 %v1513_v23, %v1224_v1 }
 0x581   : > { %1519 = vadd.xlane.f32.xlu2 %v1516_v24  ;;  %v1522_v27 = vmul.f32 %v1516_v24, %v1516_v24 }
 0x582   : > { %v1501_v25 = vpop.f32.mrf.mxu2  ;;  %v1514_v26 = vpop.f32.mrf.mxu3 }
 0x589   : > { %1523 = vadd.xlane.f32.xlu2 %v1522_v27 }
 0x5f4   : > { %v1520_v28 = vpop.xlane.xlu2 %1519 }
 0x5f5   : > { %v1521_v29 = vmul.f32 %v1520_v28, %v2571_v32 }
 0x5f7   : > { %v1526_v33 = vmul.f32 %v1521_v29, %v1521_v29  ;;  %v1528_v44 = vsub.f32 %v1516_v24, %v1521_v29 }
 0x5fc   : > { %v1524_v31 = vpop.xlane.xlu2 %1523 }
 0x5fd   : > { %v1525_v34 = vmul.f32 %v1524_v31, %v2571_v32  ;;  %v2067_v32 = vld [vmem:[%s2688_s12] ss:$0 sm:$0xff] }
 0x5ff   : > { %v1527_v35 = vsub.f32 %v1525_v34, %v1526_v33 }
 0x601   : > { %v1529_v36 = vadd.f32 1e-05, %v1527_v35 }
 0x603   : > { %2089 = vrsqrt.f32 %v1529_v36  ;;  %vm1536_vm9 = vweird.f32 %v1529_v36 }
 0x609   : > { %v2090_v37 = vpop.eup %2089 }
 0x60a   : > { %v1531_v38 = vmul.f32 %v2090_v37, %v1529_v36  ;;  %vm1537_vm8 = vweird.f32 %v2090_v37 }
 0x60b   : > { %vm1538_vm10 = vmor %vm1536_vm9, %vm1537_vm8 }
 0x60c   : > { %v1532_v39 = vmul.f32 %v2090_v37, %v1531_v38 }
 0x60e   : > { %v1533_v41 = vmul.f32 0.5, %v1532_v39 }
 0x610   : > { %v1534_v42 = vsub.f32 1.5, %v1533_v41 }
 0x612   : > { %v1535_v43 = vmul.f32 %v2090_v37, %v1534_v42 }
 0x614   : > { %v1539_v30 = vsel %vm1538_vm10, %v2090_v37, %v1535_v43 }
 0x615   : > { %v1540_v45 = vmul.f32 %v1539_v30, %v1528_v44 }
 0x617   : > { %v1544_v47 = vmul.f32 %v2067_v32, %v1540_v45 }
 0x619   : > { %v1548_v49 = vadd.f32 %v2068_v46, %v1544_v47 }
 0x61b   : > { %1549 = vst [vmem:[%s469_s17] sm:$0xff] %v1548_v49 }
 0x61c   : > { %2118 = shalt.err (!%p2115_p3)
}
 0x61d   : > { %2016 = dma.vmem_to_hbm [thread:$0]  (%p2272_p5), %s1564_s15, 128, %s1566_s19, %s1551_s24  }
 0x61e PF: > { %s2705_s26 = sld [smem:[#allocation7_spill]] }
 0x61f   : > { %s2706_s25 = sld [smem:[#allocation5_spill]] }
 0x624   : > { %p2022_p4 = scmp.ge.s32.totalorder %s2705_s26, 2 }
 0x625   : > { %s1577_s17 = sand.u32 1, %s2706_s25  }
 0x626   : > { %p2019_p7 = pnand %p2022_p4, %p2276_p6  ;;  %s1578_s28 = scalar_lea.sflag [#allocation3], %s1577_s17 }
 0x628   : > { %p2020_p8 = pneg %p2019_p7 }
 0x62a   : > { %2136 = dma.done.wait (%p2020_p8), %s1578_s28, 128  }
 0x62b   : > { %2138 = vsyncadd (%p2020_p8), %s1578_s28, 4294967168  ;;  %s2708_s16 = sld [smem:[#allocation8_spill]]  ;;  %s2711_s29 = smov %s2145_s30 }
 0x62c   : > { %s2709_s18 = sld [smem:[#allocation6_spill]] }
 0x62d   : > { %s2710_s15 = sld [smem:[#allocation9_spill]] }
 0x631   : > { %p24_p9 = scmp.ge.s32.totalorder %s2708_s16, 4  }
 0x632   : > { %s2712_s30 = smov %s2709_s18 }
 0x633   :  { %26 = sbr.rel (!%p24_p9) target bundleno = 3 (0x3), region = 114 }
 0x638   :  { %1584 = vsyncpa [#allocation3], 1 }
 0x639   :  { %1586 = vsyncpa [#allocation3 + $0x1], 1 }

// kernel: tpu_custom_call.1
= control target key start
LH: loop header
LB: loop body
LE: loop exit
PB: predicated region body
PF: predicated region fallthrough
CT: control target
= control target key end

     0   :  { %19 = vsyncpa [#allocation3], 0  ;;  %s2676_s0 = inlined_call_operand.vmem [shape: f32[2,8,128], index: 0, kind: input, shape index: {}]   ;;  %s2677_s1 = inlined_call_operand.vmem [shape: f32[2,1,8], index: 1, kind: input, shape index: {}]   ;;  %s2678_s2 = inlined_call_operand.vmem [shape: bf16[4,128,96], index: 2, kind: input, shape index: {}]   ;;  %s2679_s3 = inlined_call_operand.vmem [shape: f32[4,1,96], index: 3, kind: input, shape index: {}]   ;;  %s2680_s4 = inlined_call_operand.vmem [shape: bf16[4,32,128], index: 4, kind: input, shape index: {}]   ;;  %s2681_s5 = inlined_call_operand.vmem [shape: f32[1,128], index: 5, kind: input, shape index: {}]   ;;  %s2682_s6 = inlined_call_operand.vmem [shape: f32[1,128], index: 6, kind: input, shape index: {}]   ;;  %s2683_s7 = inlined_call_operand.vmem [shape: f32[1,128], index: 7, kind: input, shape index: {}]   ;;  %s2684_s8 = inlined_call_operand.vmem [shape: bf16[128,256], index: 8, kind: input, shape index: {}]   ;;  %s2685_s9 = inlined_call_operand.vmem [shape: f32[1,256], index: 9, kind: input, shape index: {}]   ;;  %s2686_s10 = inlined_call_operand.vmem [shape: bf16[256,128], index: 10, kind: input, shape index: {}]   ;;  %s2687_s11 = inlined_call_operand.vmem [shape: f32[1,128], index: 11, kind: input, shape index: {}]   ;;  %s2688_s12 = inlined_call_operand.vmem [shape: f32[1,128], index: 12, kind: input, shape index: {}]   ;;  %s2689_s13 = inlined_call_operand.vmem [shape: f32[1,128], index: 13, kind: input, shape index: {}]   ;;  %s2690_s14 = inlined_call_operand.hbm [shape: f32[2,8,128], index: 14, kind: output, shape index: {}]  }
   0x1   :  { %21 = vsyncpa [#allocation3 + $0x1], 0  ;;  %s2234_s29 = smov 0   ;;  %s2236_s30 = smov 0  }
   0x2   :  { %s2238_s15 = smov 0   ;;  %s2240_s16 = smov 0  }
   0x3 LB: > { %2697 = sst [smem:[#allocation5_spill]] %s2141_s29  ;;  %s2255_s17 = sadd.s32 4294967295, %s2153_s16   ;;  %s2153_s16 = sphi %s2240_s16, %s2708_s16   ;;  %s2149_s15 = sphi %s2238_s15, %s2710_s15   ;;  %s2145_s30 = sphi %s2236_s30, %s2712_s30   ;;  %s2141_s29 = sphi %s2234_s29, %s2711_s29  }
   0x4   : > { %2698 = sst [smem:[#allocation6_spill]] %s2149_s15  ;;  %s1634_s18 = sadd.s32 4294967294, %s2153_s16  }
   0x5   : > { %2699 = sst [smem:[#allocation7_spill]] %s2153_s16  ;;  %s2259_s19 = sadd.s32 1, %s2153_s16  }
   0x6   : > { %2700 = sst [smem:[#allocation8_spill]] %s2259_s19  ;;  %s338_s20 = sadd.s32 1, %s2149_s15 }
   0x7   : > { %s335_s21 = ssub.s32 %s2153_s16, %s2259_s19  ;;  %p348_p0 = scmp.ne.s32.totalorder %s2149_s15, %s2145_s30 }
   0x8   : > { %p336_p1 = scmp.eq.s32.totalorder %s335_s21, 0  ;;  %p349_p2 = scmp.eq.s32.totalorder %s2255_s17, 1 }
   0x9   : > { %p354_p3 = scmp.ne.s32.totalorder %s2145_s30, %s2141_s29  ;;  %p355_p4 = scmp.eq.s32.totalorder %s1634_s18, 1 }
   0xa   : > { %s2270_s22 = scalar_select %p336_p1, %s2149_s15, %s338_s20  }
   0xb   : > { %p2272_p5 = por %p349_p2, %p348_p0  ;;  %p2276_p6 = por %p355_p4, %p354_p3 }
   0xc   : > { %2701 = sst [smem:[#allocation9_spill]] %s2270_s22  ;;  %p1637_p7 = scmp.ge.s32.totalorder %s2153_s16, 1 }
   0xd   : > { %s2703_s24 = scalar_select %p2276_p6, 1, 0 }
   0xe   : > { %p422_p8 = scmp.lt.s32.totalorder %s2153_s16, 3 }
   0xf   : > { %2704 = sst [smem:[#allocation10_spill]] %s2703_s24 }
  0x10   : > { %p423_p9 = pnand %p1637_p7, %p422_p8 }
  0x11   : > { %p470_p10 = scmp.lt.s32.totalorder (!%p423_p9), %s2255_s17, 1  ;;  %s2155_s18 = smov (!%p423_p9), 96  }
  0x12   : > { %426 = sbr.rel (%p423_p9) target bundleno = 1566 (0x61e), region = 76  ;;  %s467_s26 = sand.u32 (!%p423_p9), 1, %s2145_s30  }
  0x13   : > { %s1638_s27 = sshll.u32 (!%p423_p9), %s467_s26, 3  ;;  %s1941_s28 = sshll.u32 (!%p423_p9), %s2255_s17, 3 }
  0x14   : > { %s1551_s24 = scalar_lea.sflag (!%p423_p9), [#allocation3], %s467_s26 }
  0x17   : > { %v1951_v0 = vld [vmem:[%s2678_s2 + $0x38] sm:$0xff]  ;;  %v1950_v4 = vld [vmem:[%s2678_s2 + $0x30] sm:$0xff]  ;;  %v1949_v8 = vld [vmem:[%s2678_s2 + $0x28] sm:$0xff]  ;;  %s2344_s25 = scalar_select %p470_p10, %s2255_s17, 1  ;;  %vm819_vm0 = vcmask 261120   ;;  %vm911_vm2 = vcmask 64512  }
  0x18   : > { %v1967_v1 = vld [vmem:[%s2678_s2 + $0xb8] sm:$0xff]  ;;  %611 = vmatpush.bf16.msra.mxu0 %v1951_v0  ;;  %v1966_v5 = vld [vmem:[%s2678_s2 + $0xb0] sm:$0xff]  ;;  %v1965_v9 = vld [vmem:[%s2678_s2 + $0xa8] sm:$0xff]  ;;  %vm965_vm3 = vcmask 1043456   ;;  %s469_s17 = scalar_lea.vmem [#allocation2], %s1638_s27 }
  0x19   : > { %v1975_v2 = vld [vmem:[%s2678_s2 + $0xf8] sm:$0xff]  ;;  %733 = vmatpush.bf16.msra.mxu2 %v1967_v1  ;;  %v1974_v6 = vld [vmem:[%s2678_s2 + $0xf0] sm:$0xff]  ;;  %v1973_v10 = vld [vmem:[%s2678_s2 + $0xe8] sm:$0xff]  ;;  %s1639_s21 = sshll.u32 %s2344_s25, 3  ;;  %s1563_s15 = sshll.u32 %s469_s17, 4  ;;  %s1564_s15 = int_to_ptr.vmem [resolvable:$true] %s1563_s15 }
  0x1a   : > { %v1959_v3 = vld [vmem:[%s2678_s2 + $0x78] sm:$0xff]  ;;  %794 = vmatpush.bf16.msra.mxu3 %v1975_v2  ;;  %v1958_v7 = vld [vmem:[%s2678_s2 + $0x70] sm:$0xff]  ;;  %v1957_v11 = vld [vmem:[%s2678_s2 + $0x68] sm:$0xff]  ;;  %s473_s16 = scalar_lea.vmem %s2676_s0, %s1639_s21  ;;  %s476_s21 = scalar_lea.vmem %s2677_s1, %s2344_s25 }
  0x1b   : > { %672 = vmatpush.bf16.msra.mxu1 %v1959_v3  ;;  %v1948_v12 = vld [vmem:[%s2678_s2 + $0x20] sm:$0xff]  ;;  %v1947_v16 = vld [vmem:[%s2678_s2 + $0x18] sm:$0xff]  ;;  %v1946_v20 = vld [vmem:[%s2678_s2 + $0x10] sm:$0xff]  ;;  %s2157_s25 = smov 64  }
  0x1c   : > { %612 = vmatpush.bf16.msra.mxu0 %v1950_v4  ;;  %v1964_v13 = vld [vmem:[%s2678_s2 + $0xa0] sm:$0xff]  ;;  %v1963_v17 = vld [vmem:[%s2678_s2 + $0x98] sm:$0xff]  ;;  %v1962_v21 = vld [vmem:[%s2678_s2 + $0x90] sm:$0xff] }
  0x1d   : > { %734 = vmatpush.bf16.msra.mxu2 %v1966_v5  ;;  %v1972_v14 = vld [vmem:[%s2678_s2 + $0xe0] sm:$0xff]  ;;  %v1971_v18 = vld [vmem:[%s2678_s2 + $0xd8] sm:$0xff]  ;;  %v1970_v22 = vld [vmem:[%s2678_s2 + $0xd0] sm:$0xff] }
  0x1e   : > { %795 = vmatpush.bf16.msra.mxu3 %v1974_v6  ;;  %v1956_v15 = vld [vmem:[%s2678_s2 + $0x60] sm:$0xff]  ;;  %v1955_v19 = vld [vmem:[%s2678_s2 + $0x58] sm:$0xff]  ;;  %v1954_v23 = vld [vmem:[%s2678_s2 + $0x50] sm:$0xff] }
  0x1f   : > { %673 = vmatpush.bf16.msra.mxu1 %v1958_v7  ;;  %v1945_v24 = vld [vmem:[%s2678_s2 + $0x8] sm:$0xff]  ;;  %v1944_v28 = vld [vmem:[%s2678_s2] sm:$0xff]  ;;  %v2156_v7 = vmov 0.0  }
  0x20   : > { %613 = vmatpush.bf16.msra.mxu0 %v1949_v8  ;;  %v1961_v25 = vld [vmem:[%s2678_s2 + $0x88] sm:$0xff]  ;;  %v1960_v29 = vld [vmem:[%s2678_s2 + $0x80] sm:$0xff] }
  0x21   : > { %735 = vmatpush.bf16.msra.mxu2 %v1965_v9  ;;  %v1969_v26 = vld [vmem:[%s2678_s2 + $0xc8] sm:$0xff]  ;;  %v2380_v30 = vld [vmem:[%s473_s16] sm:$0xff] }
  0x22   : > { %796 = vmatpush.bf16.msra.mxu3 %v1973_v10  ;;  %v1953_v27 = vld [vmem:[%s2678_s2 + $0x48] sm:$0xff]  ;;  %v1968_v31 = vld [vmem:[%s2678_s2 + $0xc0] sm:$0xff]  ;;  %v482_v33 = vpack.c.bf16 %v2380_v30, %v2380_v30 }
  0x23   : > { %674 = vmatpush.bf16.msra.mxu1 %v1957_v11  ;;  %v1952_v32 = vld [vmem:[%s2678_s2 + $0x40] sm:$0xff] }
  0x24   : > { %614 = vmatpush.bf16.msra.mxu0 %v1948_v12  ;;  %v2059_v34 = vld [vmem:[%s2679_s3] ss:$0 sm:$0xff]  ;;  %v2060_v35 = vld [vmem:[%s2679_s3 + $0x1] ss:$0 sm:$0xff]  ;;  %v2061_v41 = vld [vmem:[%s2679_s3 + $0x2] ss:$0 sm:$0xff] }
  0x25   : > { %736 = vmatpush.bf16.msra.mxu2 %v1964_v13  ;;  %v2062_v42 = vld [vmem:[%s2679_s3 + $0x3] ss:$0 sm:$0xff]  ;;  %v479_v6 = vld [vmem:[%s476_s21] sm:$0x1]  ;;  %s2111_s21 = scalar_lea.hbm %s2690_s14, 16 }
  0x26   : > { %797 = vmatpush.bf16.msra.mxu3 %v1972_v14  ;;  %vm480_vm1 = vcmp.eq.f32.partialorder %v479_v6, 0.0 }
  0x27   : > { %675 = vmatpush.bf16.msra.mxu1 %v1956_v15  ;;  %v481_v8 = vsel %vm480_vm1, -1e+09, %v2156_v7 }
  0x28   : > { %615 = vmatpush.bf16.msra.mxu0 %v1947_v16  ;;  %v812_v9 = vperm.slane %v481_v8, 0  ;;  %v1978_v8 = vld [vmem:[%s2680_s4 + $0x10] sm:$0xff] }
  0x29   : > { %737 = vmatpush.bf16.msra.mxu2 %v1963_v17 }
  0x2a   : > { %798 = vmatpush.bf16.msra.mxu3 %v1971_v18 }
  0x2b   : > { %676 = vmatpush.bf16.msra.mxu1 %v1955_v19 }
  0x2c   : > { %616 = vmatpush.bf16.msra.mxu0 %v1946_v20 }
  0x2d   : > { %738 = vmatpush.bf16.msra.mxu2 %v1962_v21 }
  0x2e   : > { %799 = vmatpush.bf16.msra.mxu3 %v1970_v22 }
  0x2f   : > { %677 = vmatpush.bf16.msra.mxu1 %v1954_v23 }
  0x30   : > { %617 = vmatpush.bf16.msra.mxu0 %v1945_v24 }
  0x31   : > { %739 = vmatpush.bf16.msra.mxu2 %v1961_v25 }
  0x32   : > { %800 = vmatpush.bf16.msra.mxu3 %v1969_v26 }
  0x33   : > { %678 = vmatpush.bf16.msra.mxu1 %v1953_v27 }
  0x34   : > { %618 = vmatpush.bf16.msra.mxu0 %v1944_v28 }
  0x35   : > { %740 = vmatpush.bf16.msra.mxu2 %v1960_v29 }
  0x36   : > { %801 = vmatpush.bf16.msra.mxu3 %v1968_v31 }
  0x37   : > { %679 = vmatpush.bf16.msra.mxu1 %v1952_v32  ;;  %619 = vmatmul.bf16.vlgmr.msra.gmra.mxu0 %v482_v33 }
  0x38   : > { %741 = vmatmul.bf16.vlgmr.msra.gmra.mxu2 %v482_v33 }
  0x39   : > { %802 = vmatmul.bf16.vlgmr.msra.gmra.mxu3 %v482_v33 }
  0x3a   : > { %680 = vmatmul.bf16.vlgmr.msra.gmra.mxu1 %v482_v33 }
  0xb4   : > { %v620_v36 = vpop.f32.mrf.mxu0 }
  0xb5   : > { %v621_v37 = vadd.f32 %v2059_v34, %v620_v36 }
  0xb7   : > { %v681_v38 = vpop.f32.mrf.mxu1  ;;  %v807_v40 = vpack.c.bf16 %v621_v37, %v621_v37 }
  0xb8   : > { %v682_v39 = vadd.f32 %v2060_v35, %v681_v38 }
  0xb9   : > { %v815_v44 = vunpack.c.l.b16 %v807_v40 }
  0xba   : > { %v808_v43 = vpack.c.bf16 %v682_v39, %v682_v39 }
  0xbb   : > { %v742_v45 = vpop.f32.mrf.mxu2  ;;  %v2402_v48 = vpack.c.b16 %v815_v44, %v815_v44 }
  0xbc   : > { %v743_v46 = vadd.f32 %v2061_v41, %v742_v45  ;;  %v803_v47 = vpop.f32.mrf.mxu3  ;;  %v622_v50 = vpop.f32.mrf.mxu0  ;;  %v840_v51 = vunpack.c.l.b16 %v808_v43 }
  0xbd   : > { %v804_v49 = vadd.f32 %v2062_v42, %v803_v47  ;;  %817 = vrot.lane.b32.xlu1 %v2402_v48, %s2155_s18 }
  0xbe   : > { %v809_v52 = vpack.c.bf16 %v743_v46, %v743_v46  ;;  %v841_v56 = vpack.c.b16 %v840_v51, %v840_v51 }
  0xbf   : > { %v683_v53 = vpop.f32.mrf.mxu1  ;;  %v810_v54 = vpack.c.bf16 %v804_v49, %v804_v49 }
  0xc0   : > { %v864_v55 = vunpack.c.l.b16 %v809_v52 }
  0xc1   : > { %v888_v59 = vunpack.c.l.b16 %v810_v54 }
  0xc2   : > { %v865_v57 = vpack.c.b16 %v864_v55, %v864_v55  ;;  %v1979_v55 = vld [vmem:[%s2680_s4 + $0x18] sm:$0xff] }
  0xc3   : > { %v744_v58 = vpop.f32.mrf.mxu2  ;;  %v889_v61 = vpack.c.b16 %v888_v59, %v888_v59 }
  0xc4   : > { %v805_v60 = vpop.f32.mrf.mxu3  ;;  %866 = vrot.lane.b32.xlu0 %v865_v57, %s2155_s18 }
  0xc5   : > { %842 = vrot.lane.b32.xlu1 %v841_v56, %s2155_s18 }
  0xcc   : > { %890 = vrot.lane.b32.xlu0 %v889_v61, %s2155_s18 }
 0x12f   : > { %v818_v62 = vpop.permute.xlu1 %817 }
 0x130   : > { %v824_v63 = vsel %vm819_vm0, %v818_v62, 0 }
 0x131   : > { %833 = vmatpush.bf16.xpose.msrb.mxu0 %v824_v63 }
 0x136   : > { %v867_v0 = vpop.permute.xlu0 %866 }
 0x137   : > { %v872_v1 = vsel %vm819_vm0, %v867_v0, 0  ;;  %v843_v2 = vpop.permute.xlu1 %842 }
 0x138   : > { %881 = vmatpush.bf16.xpose.msrb.mxu2 %v872_v1  ;;  %1768 = vmatmul.msk.bf16.vlgmr.msrb.gmra.mxu0 %vm819_vm0, %v807_v40  ;;  %v848_v3 = vsel %vm819_vm0, %v843_v2, 0 }
 0x139   : > { %857 = vmatpush.bf16.xpose.msrb.mxu1 %v848_v3 }
 0x13e   : > { %v891_v4 = vpop.permute.xlu0 %890 }
 0x13f   : > { %1770 = vmatmul.msk.bf16.vlgmr.msrb.gmra.mxu2 %vm819_vm0, %v809_v52  ;;  %v896_v5 = vsel %vm819_vm0, %v891_v4, 0 }
 0x140   : > { %905 = vmatpush.bf16.xpose.msrb.mxu3 %v896_v5  ;;  %1769 = vmatmul.msk.bf16.vlgmr.msrb.gmra.mxu1 %vm819_vm0, %v808_v43 }
 0x147   : > { %1771 = vmatmul.msk.bf16.vlgmr.msrb.gmra.mxu3 %vm819_vm0, %v810_v54 }
 0x1b5   : > { %v835_v10 = vpop.f32.mrf.mxu0 }
 0x1b6   : > { %v836_v11 = vadd.f32 %v835_v10, %v812_v9  ;;  %v1980_v10 = vld [vmem:[%s2680_s4 + $0x20] sm:$0xff] }
 0x1b8   : > { %v912_v12 = vsel %vm911_vm2, %v836_v11, -inf }
 0x1b9   : > { %913 = vmax.xlane.f32.xlu0 %v912_v12  ;;  %v1977_v12 = vld [vmem:[%s2680_s4 + $0x8] sm:$0xff] }
 0x1bd   : > { %v837_v13 = vpop.f32.mrf.mxu0  ;;  %v859_v14 = vpop.f32.mrf.mxu1 }
 0x1be   : > { %v860_v15 = vadd.f32 %v859_v14, %v812_v9  ;;  %v1982_v13 = vld [vmem:[%s2680_s4 + $0x30] sm:$0xff]  ;;  %v1976_v14 = vld [vmem:[%s2680_s4] sm:$0xff] }
 0x1c0   : > { %v915_v16 = vsel %vm911_vm2, %v860_v15, -inf }
 0x1c1   : > { %916 = vmax.xlane.f32.xlu1 %v915_v16 }
 0x1c2   : > { %v883_v17 = vpop.f32.mrf.mxu2 }
 0x1c3   : > { %v884_v18 = vadd.f32 %v883_v17, %v812_v9 }
 0x1c5   : > { %v918_v19 = vsel %vm911_vm2, %v884_v18, -inf  ;;  %v861_v20 = vpop.f32.mrf.mxu1 }
 0x1c6   : > { %919 = vmax.xlane.f32.xlu2 %v918_v19 }
 0x1ca   : > { %v885_v21 = vpop.f32.mrf.mxu2  ;;  %v907_v22 = vpop.f32.mrf.mxu3 }
 0x1cb   : > { %v908_v23 = vadd.f32 %v907_v22, %v812_v9  ;;  %v1981_v9 = vld [vmem:[%s2680_s4 + $0x28] sm:$0xff] }
 0x1cd   : > { %v921_v24 = vsel %vm911_vm2, %v908_v23, -inf }
 0x1ce   : > { %922 = vmax.xlane.f32.xlu2 %v921_v24 }
 0x1d2   : > { %v909_v25 = vpop.f32.mrf.mxu3 }
 0x1da   : > { %1024 = vrot.lane.b32.xlu1 %v889_v61, %s2157_s25 }
 0x1e2   : > { %982 = vrot.lane.b32.xlu1 %v841_v56, %s2157_s25 }
 0x1e6   : > { %1003 = vrot.lane.b32.xlu2 %v865_v57, %s2157_s25 }
 0x22c   : > { %v914_v34 = vpop.xlane.xlu0 %913 }
 0x22d   : > { %v924_v39 = vsub.f32 %v836_v11, %v914_v34  ;;  %v1983_v11 = vld [vmem:[%s2680_s4 + $0x38] sm:$0xff]  ;;  %v2063_v34 = vld [vmem:[%s2681_s5] ss:$0 sm:$0xff] }
 0x22f   : > { %v928_v42 = vmul.f32 1.442695, %v924_v39 }
 0x234   : > { %v917_v26 = vpop.xlane.xlu1 %916 }
 0x235   : > { %v925_v27 = vsub.f32 %v860_v15, %v917_v26 }
 0x237   : > { %v930_v28 = vmul.f32 1.442695, %v925_v27 }
 0x239   : > { %v920_v29 = vpop.xlane.xlu2 %919  ;;  %2069 = vpow2.f32 %v930_v28 }
 0x23a   : > { %v926_v31 = vsub.f32 %v884_v18, %v920_v29 }
 0x23c   : > { %v932_v32 = vmul.f32 1.442695, %v926_v31 }
 0x23e   : > { %2071 = vpow2.f32 %v932_v32 }
 0x23f   : > { %v2070_v33 = vpop.eup %2069 }
 0x240   : > { %v939_v36 = vsel %vm911_vm2, %v2070_v33, 0.0 }
 0x241   : > { %v923_v35 = vpop.xlane.xlu2 %922  ;;  %940 = vadd.xlane.f32.xlu0 %v939_v36 }
 0x242   : > { %v927_v37 = vsub.f32 %v908_v23, %v923_v35 }
 0x244   : > { %v2072_v38 = vpop.eup %2071  ;;  %v934_v40 = vmul.f32 1.442695, %v927_v37 }
 0x245   : > { %v942_v41 = vsel %vm911_vm2, %v2072_v38, 0.0 }
 0x246   : > { %2073 = vpow2.f32 %v934_v40  ;;  %943 = vadd.xlane.f32.xlu2 %v942_v41 }
 0x247   : > { %2075 = vpow2.f32 %v928_v42 }
 0x249   : > { %v1004_v43 = vpop.permute.xlu2 %1003 }
 0x24a   : > { %v1009_v44 = vsel %vm965_vm3, %v1004_v43, 0  ;;  %v1870_v43 = vld [vmem:[%s2684_s8 + $0x70] sm:$0xf] }
 0x24b   : > { %1018 = vmatpush.bf16.msra.mxu2 %v1009_v44  ;;  %v1999_v44 = vld [vmem:[%s2684_s8 + $0x74] sm:$0xf0] }
 0x24c   : > { %v2074_v45 = vpop.eup %2073  ;;  %v1025_v46 = vpop.permute.xlu1 %1024 }
 0x24d   : > { %v945_v47 = vsel %vm911_vm2, %v2074_v45, 0.0  ;;  %v1030_v49 = vsel %vm965_vm3, %v1025_v46, 0  ;;  %v2076_v50 = vpop.eup %2075  ;;  %v1872_v46 = vld [vmem:[%s2684_s8 + $0x78] sm:$0xf0] }
 0x24e   : > { %946 = vadd.xlane.f32.xlu2 %v945_v47  ;;  %1039 = vmatpush.bf16.msra.mxu3 %v1030_v49  ;;  %v936_v52 = vsel %vm911_vm2, %v2076_v50, 0.0  ;;  %v2158_v47 = vmov 128.0  }
 0x24f   : > { %1142 = vmatpush.bf16.msrb.mxu2 %v1981_v9 }
 0x252   : > { %1170 = vmatpush.bf16.msrb.mxu3 %v1983_v11 }
 0x253   : > { %1143 = vmatpush.bf16.msrb.mxu2 %v1980_v10  ;;  %v1840_v10 = vld [vmem:[%s2684_s8 + $0x38] sm:$0xf0] }
 0x254   : > { %v983_v51 = vpop.permute.xlu1 %982 }
 0x255   : > { %v988_v53 = vsel %vm965_vm3, %v983_v51, 0  ;;  %960 = vrot.lane.b32.xlu0 %v2402_v48, %s2157_s25  ;;  %v1997_v51 = vld [vmem:[%s2684_s8 + $0x64] sm:$0xf0]  ;;  %s1561_s25 = scalar_lea.hbm %s2690_s14, %s1941_s28 }
 0x256   : > { %937 = vadd.xlane.f32.xlu2 %v936_v52  ;;  %997 = vmatpush.bf16.msra.mxu1 %v988_v53  ;;  %v1996_v52 = vld [vmem:[%s2684_s8 + $0x64] sm:$0xf]  ;;  %s1565_s19 = sshll.u32 %s1561_s25, 4  ;;  %s1566_s19 = int_to_ptr.hbm [resolvable:$true] %s1565_s19 }
 0x257   : > { %1171 = vmatpush.bf16.msrb.mxu3 %v1982_v13  ;;  %v1830_v13 = vld [vmem:[%s2684_s8 + $0x20] sm:$0xf]  ;;  %s2105_s18 = sshra.s32 %s1566_s19, 4  ;;  %s2106_s18 = int_to_ptr.hbm [resolvable:$true] %s2105_s18 }
 0x258   : > { %s2107_s20 = scalar_lea.hbm %s2106_s18, 8  ;;  %p2112_p0 = scmp.lt.s32.totalorder %s2106_s18, %s2690_s14 }
 0x259   : > { %p2108_p11 = scmp.ne.s32.totalorder %s2106_s18, %s2107_s20  ;;  %p2113_p1 = scmp.lt.s32.totalorder %s2111_s21, %s2107_s20 }
 0x25a   : > { %1114 = vmatpush.bf16.msrb.mxu1 %v1979_v55 }
 0x25b   : > { %p2109_p12 = pnand %p2108_p11, %p2272_p5  ;;  %p2114_p2 = por %p2113_p1, %p2112_p0 }
 0x25d   : > { %p2110_p13 = pneg %p2109_p12 }
 0x25e   : > { %1115 = vmatpush.bf16.msrb.mxu1 %v1978_v8  ;;  %v1990_v8 = vld [vmem:[%s2684_s8 + $0x34] sm:$0xf] }
 0x25f   : > { %v1843_v11 = vor.u32 %v1990_v8, %v1840_v10  ;;  %p2115_p3 = pnand %p2114_p2, %p2110_p13 }
 0x2b4   : > { %v941_v54 = vpop.xlane.xlu0 %940 }
 0x2b5   : > { %2077 = vrcp.f32 %v941_v54  ;;  %v1864_v54 = vld [vmem:[%s2684_s8 + $0x68] sm:$0xf0] }
 0x2b6   : > { %v1867_v55 = vor.u32 %v1996_v52, %v1864_v54  ;;  %v2003_v52 = vld [vmem:[%s2686_s10 + $0x18] sm:$0xff] }
 0x2b9   : > { %v944_v56 = vpop.xlane.xlu2 %943 }
 0x2ba   : > { %2079 = vrcp.f32 %v944_v56 }
 0x2bb   : > { %v2078_v57 = vpop.eup %2077 }
 0x2bc   : > { %v953_v58 = vmul.f32 %v2078_v57, %v2070_v33  ;;  %v1854_v57 = vld [vmem:[%s2684_s8 + $0x50] sm:$0xf] }
 0x2be   : > { %v957_v59 = vpack.c.bf16 %v953_v58, %v953_v58  ;;  %v1995_v58 = vld [vmem:[%s2684_s8 + $0x54] sm:$0xf0] }
 0x2c0   : > { %v2080_v60 = vpop.eup %2079  ;;  %1773 = vmatmul.msk.bf16.vlgmr.msra.gmra.mxu1 %vm911_vm2, %v957_v59  ;;  %v1994_v59 = vld [vmem:[%s2684_s8 + $0x54] sm:$0xf] }
 0x2c1   : > { %v954_v61 = vmul.f32 %v2080_v60, %v2072_v38  ;;  %v947_v62 = vpop.xlane.xlu2 %946  ;;  %v1855_v60 = vor.u32 %v1995_v58, %v1854_v57  ;;  %v2010_v57 = vld [vmem:[%s2686_s10 + $0x50] sm:$0xff] }
 0x2c2   : > { %2081 = vrcp.f32 %v947_v62 }
 0x2c3   : > { %v958_v48 = vpack.c.bf16 %v954_v61, %v954_v61  ;;  %v1856_v61 = vld [vmem:[%s2684_s8 + $0x58] sm:$0xf0] }
 0x2c4   : > { %v1859_v62 = vor.u32 %v1994_v59, %v1856_v61  ;;  %v2064_v61 = vld [vmem:[%s2682_s6] ss:$0 sm:$0xff] }
 0x2c5   : > { %1774 = vmatmul.msk.bf16.vlgmr.msra.gmra.mxu2 %vm911_vm2, %v958_v48 }
 0x2c7   : > { %v961_v0 = vpop.permute.xlu0 %960 }
 0x2c8   : > { %v2082_v63 = vpop.eup %2081  ;;  %v967_v2 = vsel %vm965_vm3, %v961_v0, 0  ;;  %v1993_v0 = vld [vmem:[%s2684_s8 + $0x44] sm:$0xf0] }
 0x2c9   : > { %v955_v1 = vmul.f32 %v2082_v63, %v2074_v45  ;;  %v938_v3 = vpop.xlane.xlu2 %937  ;;  %976 = vmatpush.bf16.msra.mxu0 %v967_v2  ;;  %v1871_v45 = vor.u32 %v1999_v44, %v1870_v43  ;;  %v1846_v63 = vld [vmem:[%s2684_s8 + $0x40] sm:$0xf]  ;;  %v2006_v43 = vld [vmem:[%s2686_s10 + $0x30] sm:$0xff] }
 0x2ca   : > { %2083 = vrcp.f32 %v938_v3  ;;  %v1847_v2 = vor.u32 %v1993_v0, %v1846_v63  ;;  %v1848_v3 = vld [vmem:[%s2684_s8 + $0x48] sm:$0xf0]  ;;  %v2014_v44 = vld [vmem:[%s2686_s10 + $0x70] sm:$0xff]  ;;  %v2065_v63 = vld [vmem:[%s2683_s7] ss:$0 sm:$0xff] }
 0x2cb   : > { %v959_v4 = vpack.c.bf16 %v955_v1, %v955_v1  ;;  %2085 = vrcp.f32 %v2158_v47  ;;  %v1992_v1 = vld [vmem:[%s2684_s8 + $0x44] sm:$0xf] }
 0x2cc   : > { %v2004_v47 = vld [vmem:[%s2686_s10 + $0x20] sm:$0xff] }
 0x2cd   : > { %1775 = vmatmul.msk.bf16.vlgmr.msra.gmra.mxu3 %vm911_vm2, %v959_v4  ;;  %1086 = vmatpush.bf16.msrb.mxu0 %v1977_v12  ;;  %v1851_v4 = vor.u32 %v1992_v1, %v1848_v3  ;;  %v2009_v3 = vld [vmem:[%s2686_s10 + $0x48] sm:$0xff] }
 0x2d0   : > { %v2084_v5 = vpop.eup %2083 }
 0x2d1   : > { %v952_v6 = vmul.f32 %v2084_v5, %v2076_v50  ;;  %1087 = vmatpush.bf16.msrb.mxu0 %v1976_v14  ;;  %v1862_v50 = vld [vmem:[%s2684_s8 + $0x60] sm:$0xf]  ;;  %v2086_v56 = vpop.eup %2085  ;;  %v1989_v14 = vld [vmem:[%s2684_s8 + $0x24] sm:$0xf0] }
 0x2d2   : > { %v1863_v53 = vor.u32 %v1997_v51, %v1862_v50  ;;  %v1191_v48 = vmul.f32 128.0, %v2086_v56  ;;  %vm1195_vm4 = vweird.f32 %v2086_v56 }
 0x2d3   : > { %v956_v7 = vpack.c.bf16 %v952_v6, %v952_v6  ;;  %v1838_v6 = vld [vmem:[%s2684_s8 + $0x30] sm:$0xf] }
 0x2d4   : > { %v1192_v5 = vsub.f32 1.0, %v1191_v48 }
 0x2d5   : > { %1772 = vmatmul.msk.bf16.vlgmr.msra.gmra.mxu0 %vm911_vm2, %v956_v7  ;;  %v1991_v7 = vld [vmem:[%s2684_s8 + $0x34] sm:$0xf0] }
 0x2d6   : > { %1328 = vmatpush.bf16.msra.mxu0 %v1871_v45  ;;  %v1839_v9 = vor.u32 %v1991_v7, %v1838_v6  ;;  %v1193_v12 = vmul.f32 %v2086_v56, %v1192_v5  ;;  %v2005_v45 = vld [vmem:[%s2686_s10 + $0x28] sm:$0xff]  ;;  %v2008_v5 = vld [vmem:[%s2686_s10 + $0x40] sm:$0xff] }
 0x2d7   : > { %v1242_v6 = vld [vmem:[%s2685_s9] sm:$0x3] }
 0x2d8   : > { %v1244_v7 = vperm.slane %v1242_v6, 0  ;;  %v1245_v8 = vperm.slane %v1242_v6, 1 }
 0x2da   : > { %1329 = vmatpush.bf16.msra.mxu0 %v1863_v53  ;;  %v2011_v53 = vld [vmem:[%s2686_s10 + $0x58] sm:$0xff] }
 0x2de   : > { %1330 = vmatpush.bf16.msra.mxu0 %v1855_v60 }
 0x2e2   : > { %1331 = vmatpush.bf16.msra.mxu0 %v1847_v2 }
 0x2e6   : > { %1332 = vmatpush.bf16.msra.mxu0 %v1839_v9 }
 0x33d   : > { %v999_v15 = vpop.f32.mrf.mxu1 }
 0x33e   : > { %v1046_v16 = vpack.c.bf16 %v999_v15, %v999_v15  ;;  %v1988_v15 = vld [vmem:[%s2684_s8 + $0x24] sm:$0xf] }
 0x340   : > { %1793 = vmatmul.msk.bf16.vlgmr.msrb.gmra.mxu1 %vm819_vm0, %v1046_v16  ;;  %v1831_v16 = vor.u32 %v1989_v14, %v1830_v13 }
 0x342   : > { %1333 = vmatpush.bf16.msra.mxu0 %v1831_v16 }
 0x345   : > { %v1001_v17 = vpop.f32.mrf.mxu1 }
 0x346   : > { %v1832_v17 = vld [vmem:[%s2684_s8 + $0x28] sm:$0xf0] }
 0x348   : > { %v1020_v18 = vpop.f32.mrf.mxu2 }
 0x349   : > { %v1047_v19 = vpack.c.bf16 %v1020_v18, %v1020_v18  ;;  %v1835_v18 = vor.u32 %v1988_v15, %v1832_v17 }
 0x34b   : > { %1802 = vmatmul.msk.bf16.vlgmr.msrb.gmra.mxu2 %vm819_vm0, %v1047_v19  ;;  %v1194_v19 = vadd.f32 %v2086_v56, %v1193_v12 }
 0x350   : > { %v1022_v20 = vpop.f32.mrf.mxu2  ;;  %v1041_v21 = vpop.f32.mrf.mxu3 }
 0x351   : > { %v1048_v22 = vpack.c.bf16 %v1041_v21, %v1041_v21  ;;  %v1822_v20 = vld [vmem:[%s2684_s8 + $0x10] sm:$0xf]  ;;  %v1987_v21 = vld [vmem:[%s2684_s8 + $0x14] sm:$0xf0] }
 0x352   : > { %v978_v23 = vpop.f32.mrf.mxu0 }
 0x353   : > { %v1045_v24 = vpack.c.bf16 %v978_v23, %v978_v23  ;;  %1811 = vmatmul.msk.bf16.vlgmr.msrb.gmra.mxu3 %vm819_vm0, %v1048_v22  ;;  %v1986_v22 = vld [vmem:[%s2684_s8 + $0x14] sm:$0xf]  ;;  %v1823_v23 = vor.u32 %v1987_v21, %v1822_v20 }
 0x355   : > { %1784 = vmatmul.msk.bf16.vlgmr.msrb.gmra.mxu0 %vm819_vm0, %v1045_v24  ;;  %v1824_v24 = vld [vmem:[%s2684_s8 + $0x18] sm:$0xf0] }
 0x356   : > { %1334 = vmatpush.bf16.msra.mxu0 %v1823_v23 }
 0x358   : > { %v1043_v25 = vpop.f32.mrf.mxu3 }
 0x359   : > { %v1814_v25 = vld [vmem:[%s2684_s8] sm:$0xf] }
 0x35a   : > { %v980_v26 = vpop.f32.mrf.mxu0 }
 0x35b   : > { %v1985_v26 = vld [vmem:[%s2684_s8 + $0x4] sm:$0xf0] }
 0x3bd   : > { %v1117_v27 = vpop.f32.mrf.mxu1 }
 0x3c5   : > { %v1119_v28 = vpop.f32.mrf.mxu1 }
 0x3c6   : > { %v1984_v28 = vld [vmem:[%s2684_s8 + $0x4] sm:$0xf] }
 0x3ce   : > { %v1145_v29 = vpop.f32.mrf.mxu2 }
 0x3d2   : > { %v1089_v31 = vpop.f32.mrf.mxu0 }
 0x3d3   : > { %v1177_v32 = vadd.f32 %v1117_v27, %v1089_v31  ;;  %v1827_v27 = vor.u32 %v1986_v22, %v1824_v24  ;;  %v1815_v31 = vor.u32 %v1985_v26, %v1814_v25 }
 0x3d5   : > { %v1178_v33 = vadd.f32 %v1177_v32, %v1145_v29  ;;  %v1816_v29 = vld [vmem:[%s2684_s8 + $0x8] sm:$0xf0]  ;;  %v2571_v32 = vsel %vm1195_vm4, %v2086_v56, %v1194_v19  ;;  %1335 = vmatpush.bf16.msra.mxu0 %v1815_v31  ;;  %v2002_v56 = vld [vmem:[%s2686_s10 + $0x10] sm:$0xff]  ;;  %v2066_v19 = vld [vmem:[%s2687_s11] ss:$0 sm:$0xff] }
 0x3d6   : > { %v1147_v35 = vpop.f32.mrf.mxu2  ;;  %v1173_v36 = vpop.f32.mrf.mxu3 }
 0x3d7   : > { %v1179_v37 = vadd.f32 %v1178_v33, %v1173_v36  ;;  %v1819_v33 = vor.u32 %v1984_v28, %v1816_v29 }
 0x3d9   : > { %v1184_v38 = vadd.f32 %v2063_v34, %v1179_v37 }
 0x3da   : > { %v1091_v39 = vpop.f32.mrf.mxu0 }
 0x3db   : > { %v2470_v40 = vadd.f32 %v1184_v38, %v2380_v30  ;;  %v1998_v30 = vld [vmem:[%s2684_s8 + $0x74] sm:$0xf]  ;;  %v2007_v39 = vld [vmem:[%s2686_s10 + $0x38] sm:$0xff] }
 0x3dc   : > { %v1875_v49 = vor.u32 %v1998_v30, %v1872_v46  ;;  %1490 = vmatpush.bf16.msra.mxu2 %v2007_v39  ;;  %v2013_v46 = vld [vmem:[%s2686_s10 + $0x68] sm:$0xff] }
 0x3dd   : > { %1188 = vadd.xlane.f32.xlu0 %v2470_v40  ;;  %v1198_v41 = vmul.f32 %v2470_v40, %v2470_v40 }
 0x3de   : > { %v1175_v42 = vpop.f32.mrf.mxu3  ;;  %1341 = vmatpush.bf16.msra.mxu1 %v1875_v49  ;;  %v2012_v49 = vld [vmem:[%s2686_s10 + $0x60] sm:$0xff] }
 0x3df   : > { %1199 = vadd.xlane.f32.xlu1 %v1198_v41  ;;  %v2015_v41 = vld [vmem:[%s2686_s10 + $0x78] sm:$0xff] }
 0x3e0   : > { %1503 = vmatpush.bf16.msra.mxu3 %v2015_v41  ;;  %1491 = vmatpush.bf16.msra.mxu2 %v2006_v43 }
 0x3e2   : > { %1342 = vmatpush.bf16.msra.mxu1 %v1867_v55 }
 0x3e4   : > { %1504 = vmatpush.bf16.msra.mxu3 %v2014_v44  ;;  %1492 = vmatpush.bf16.msra.mxu2 %v2005_v45 }
 0x3e6   : > { %1343 = vmatpush.bf16.msra.mxu1 %v1859_v62 }
 0x3e8   : > { %1505 = vmatpush.bf16.msra.mxu3 %v2013_v46  ;;  %1493 = vmatpush.bf16.msra.mxu2 %v2004_v47  ;;  %v2068_v46 = vld [vmem:[%s2689_s13] ss:$0 sm:$0xff] }
 0x3ea   : > { %1344 = vmatpush.bf16.msra.mxu1 %v1851_v4  ;;  %v2000_v4 = vld [vmem:[%s2686_s10] sm:$0xff] }
 0x3ec   : > { %1506 = vmatpush.bf16.msra.mxu3 %v2012_v49  ;;  %1494 = vmatpush.bf16.msra.mxu2 %v2003_v52 }
 0x3ee   : > { %1345 = vmatpush.bf16.msra.mxu1 %v1843_v11 }
 0x3f0   : > { %1507 = vmatpush.bf16.msra.mxu3 %v2011_v53  ;;  %1495 = vmatpush.bf16.msra.mxu2 %v2002_v56 }
 0x3f2   : > { %1346 = vmatpush.bf16.msra.mxu1 %v1835_v18 }
 0x3f4   : > { %1508 = vmatpush.bf16.msra.mxu3 %v2010_v57 }
 0x3f6   : > { %1347 = vmatpush.bf16.msra.mxu1 %v1827_v27 }
 0x3f8   : > { %1509 = vmatpush.bf16.msra.mxu3 %v2009_v3 }
 0x3fa   : > { %1348 = vmatpush.bf16.msra.mxu1 %v1819_v33 }
 0x3fc   : > { %1510 = vmatpush.bf16.msra.mxu3 %v2008_v5 }
 0x450   : > { %v1189_v34 = vpop.xlane.xlu0 %1188 }
 0x451   : > { %v1197_v35 = vmul.f32 %v2571_v32, %v1189_v34 }
 0x452   : > { %v1200_v36 = vpop.xlane.xlu1 %1199 }
 0x453   : > { %v1202_v37 = vmul.f32 %v1197_v35, %v1197_v35  ;;  %v1201_v38 = vmul.f32 %v1200_v36, %v2571_v32  ;;  %v1204_v60 = vsub.f32 %v2470_v40, %v1197_v35  ;;  %v2001_v40 = vld [vmem:[%s2686_s10 + $0x8] sm:$0xff] }
 0x454   : > { %1496 = vmatpush.bf16.msra.mxu2 %v2001_v40 }
 0x455   : > { %v1203_v42 = vsub.f32 %v1201_v38, %v1202_v37 }
 0x457   : > { %v1205_v30 = vadd.f32 1e-05, %v1203_v42 }
 0x458   : > { %1497 = vmatpush.bf16.msra.mxu2 %v2000_v4 }
 0x459   : > { %2087 = vrsqrt.f32 %v1205_v30  ;;  %vm1212_vm6 = vweird.f32 %v1205_v30 }
 0x45f   : > { %v2088_v50 = vpop.eup %2087 }
 0x460   : > { %v1207_v51 = vmul.f32 %v2088_v50, %v1205_v30  ;;  %vm1213_vm5 = vweird.f32 %v2088_v50 }
 0x461   : > { %vm1214_vm7 = vmor %vm1212_vm6, %vm1213_vm5 }
 0x462   : > { %v1208_v54 = vmul.f32 %v2088_v50, %v1207_v51 }
 0x464   : > { %v1209_v55 = vmul.f32 0.5, %v1208_v54 }
 0x466   : > { %v1210_v58 = vsub.f32 1.5, %v1209_v55 }
 0x468   : > { %v1211_v59 = vmul.f32 %v2088_v50, %v1210_v58 }
 0x46a   : > { %v1215_v62 = vsel %vm1214_vm7, %v2088_v50, %v1211_v59 }
 0x46b   : > { %v1216_v48 = vmul.f32 %v1215_v62, %v1204_v60 }
 0x46d   : > { %v1220_v0 = vmul.f32 %v2064_v61, %v1216_v48 }
 0x46f   : > { %v1224_v1 = vadd.f32 %v2065_v63, %v1220_v0 }
 0x471   : > { %v1225_v2 = vpack.c.bf16 %v1224_v1, %v1224_v1 }
 0x473   : > { %1336 = vmatmul.bf16.vlgmr.msra.gmra.mxu0 %v1225_v2  ;;  %1349 = vmatmul.bf16.vlgmr.msra.gmra.mxu1 %v1225_v2 }
 0x4f0   : > { %v1337_v9 = vpop.f32.mrf.mxu0  ;;  %v1350_v10 = vpop.f32.mrf.mxu1 }
 0x4f1   : > { %v1338_v11 = vadd.f32 %v1337_v9, %v1244_v7  ;;  %v1351_v12 = vadd.f32 %v1350_v10, %v1245_v8 }
 0x4f3   : > { %v1354_v13 = vmax.f32 %v1338_v11, 0.0  ;;  %v1355_v14 = vmax.f32 %v1351_v12, 0.0 }
 0x4f5   : > { %v1356_v15 = vpack.c.bf16 %v1354_v13, %v1354_v13  ;;  %v1357_v16 = vpack.c.bf16 %v1355_v14, %v1355_v14 }
 0x4f7   : > { %1498 = vmatmul.bf16.vlgmr.msra.gmra.mxu2 %v1356_v15  ;;  %1511 = vmatmul.bf16.vlgmr.msra.gmra.mxu3 %v1357_v16 }
 0x4f8   : > { %v1339_v17 = vpop.f32.mrf.mxu0  ;;  %v1352_v18 = vpop.f32.mrf.mxu1 }
 0x57a   : > { %v1499_v20 = vpop.f32.mrf.mxu2  ;;  %v1512_v21 = vpop.f32.mrf.mxu3 }
 0x57b   : > { %v1500_v22 = vadd.f32 %v2066_v19, %v1499_v20 }
 0x57d   : > { %v1513_v23 = vadd.f32 %v1512_v21, %v1500_v22 }
 0x57f   : > { %v1516_v24 = vadd.f32 %v1513_v23, %v1224_v1 }
 0x581   : > { %1519 = vadd.xlane.f32.xlu2 %v1516_v24  ;;  %v1522_v27 = vmul.f32 %v1516_v24, %v1516_v24 }
 0x582   : > { %v1501_v25 = vpop.f32.mrf.mxu2  ;;  %v1514_v26 = vpop.f32.mrf.mxu3 }
 0x589   : > { %1523 = vadd.xlane.f32.xlu2 %v1522_v27 }
 0x5f4   : > { %v1520_v28 = vpop.xlane.xlu2 %1519 }
 0x5f5   : > { %v1521_v29 = vmul.f32 %v1520_v28, %v2571_v32 }
 0x5f7   : > { %v1526_v33 = vmul.f32 %v1521_v29, %v1521_v29  ;;  %v1528_v44 = vsub.f32 %v1516_v24, %v1521_v29 }
 0x5fc   : > { %v1524_v31 = vpop.xlane.xlu2 %1523 }
 0x5fd   : > { %v1525_v34 = vmul.f32 %v1524_v31, %v2571_v32  ;;  %v2067_v32 = vld [vmem:[%s2688_s12] ss:$0 sm:$0xff] }
 0x5ff   : > { %v1527_v35 = vsub.f32 %v1525_v34, %v1526_v33 }
 0x601   : > { %v1529_v36 = vadd.f32 1e-05, %v1527_v35 }
 0x603   : > { %2089 = vrsqrt.f32 %v1529_v36  ;;  %vm1536_vm9 = vweird.f32 %v1529_v36 }
 0x609   : > { %v2090_v37 = vpop.eup %2089 }
 0x60a   : > { %v1531_v38 = vmul.f32 %v2090_v37, %v1529_v36  ;;  %vm1537_vm8 = vweird.f32 %v2090_v37 }
 0x60b   : > { %vm1538_vm10 = vmor %vm1536_vm9, %vm1537_vm8 }
 0x60c   : > { %v1532_v39 = vmul.f32 %v2090_v37, %v1531_v38 }
 0x60e   : > { %v1533_v41 = vmul.f32 0.5, %v1532_v39 }
 0x610   : > { %v1534_v42 = vsub.f32 1.5, %v1533_v41 }
 0x612   : > { %v1535_v43 = vmul.f32 %v2090_v37, %v1534_v42 }
 0x614   : > { %v1539_v30 = vsel %vm1538_vm10, %v2090_v37, %v1535_v43 }
 0x615   : > { %v1540_v45 = vmul.f32 %v1539_v30, %v1528_v44 }
 0x617   : > { %v1544_v47 = vmul.f32 %v2067_v32, %v1540_v45 }
 0x619   : > { %v1548_v49 = vadd.f32 %v2068_v46, %v1544_v47 }
 0x61b   : > { %1549 = vst [vmem:[%s469_s17] sm:$0xff] %v1548_v49 }
 0x61c   : > { %2118 = shalt.err (!%p2115_p3)
}
 0x61d   : > { %2016 = dma.vmem_to_hbm [thread:$0]  (%p2272_p5), %s1564_s15, 128, %s1566_s19, %s1551_s24  }
 0x61e PF: > { %s2705_s26 = sld [smem:[#allocation7_spill]] }
 0x61f   : > { %s2706_s25 = sld [smem:[#allocation5_spill]] }
 0x624   : > { %p2022_p4 = scmp.ge.s32.totalorder %s2705_s26, 2 }
 0x625   : > { %s1577_s17 = sand.u32 1, %s2706_s25  }
 0x626   : > { %p2019_p7 = pnand %p2022_p4, %p2276_p6  ;;  %s1578_s28 = scalar_lea.sflag [#allocation3], %s1577_s17 }
 0x628   : > { %p2020_p8 = pneg %p2019_p7 }
 0x62a   : > { %2136 = dma.done.wait (%p2020_p8), %s1578_s28, 128  }
 0x62b   : > { %2138 = vsyncadd (%p2020_p8), %s1578_s28, 4294967168  ;;  %s2708_s16 = sld [smem:[#allocation8_spill]]  ;;  %s2711_s29 = smov %s2145_s30 }
 0x62c   : > { %s2709_s18 = sld [smem:[#allocation6_spill]] }
 0x62d   : > { %s2710_s15 = sld [smem:[#allocation9_spill]] }
 0x631   : > { %p24_p9 = scmp.ge.s32.totalorder %s2708_s16, 4  }
 0x632   : > { %s2712_s30 = smov %s2709_s18 }
 0x633   :  { %26 = sbr.rel (!%p24_p9) target bundleno = 3 (0x3), region = 114 }
 0x638   :  { %1584 = vsyncpa [#allocation3], 1 }
 0x639   :  { %1586 = vsyncpa [#allocation3 + $0x1], 1 }

</bundles_post_ra>
